<compile_context>
chip_gen: v6e
topology: v6e:2x2x1
jax: 0.10.0
libtpu: 0.0.40
codegen_flags: <defaults>
</compile_context>

<pallas_src>
import jax
import jax.numpy as jnp
from jax.experimental import pallas as pl
from jax.experimental.pallas import tpu as pltpu

# Tap offset orders shared by the weight/mask prep and the kernel.
OFFS3 = [(dy, dx) for dy in (-1, 0, 1) for dx in (-1, 0, 1)]          # 9 taps
OFFS5 = [(dy, dx) for dy in range(-2, 3) for dx in range(-2, 3)]      # 25 taps


def _silu(v):
    return v * jax.nn.sigmoid(v)


def _make_kernel(H, W, c1, c2):
    HW = H * W
    min_ch = c2 // 2
    mc2 = min_ch // 2

    def tap_loop(src, mask_ref, wts, offs, wt_idx):
        """Depthwise accumulation over `offs` on src (C, HW); wts is (C, K).

        In-register halo: lane roll (XLU) by dy*W+dx plus a precomputed
        validity-mask multiply.  Two accumulators give VALU ILP.
        """
        accs = [None, None]
        for n, (dy, dx) in enumerate(offs):
            wcol = wts[:, wt_idx(dy, dx):wt_idx(dy, dx) + 1]          # (C, 1)
            if dy == 0 and dx == 0:
                tap = src * wcol                                      # center tap
            else:
                s = dy * W + dx
                shifted = pltpu.roll(src, (-s) % HW, 1)               # XLU rotate
                t5 = (dy + 2) * 5 + (dx + 2)                          # mask row
                tap = (shifted * mask_ref[t5:t5 + 1, :]) * wcol
            k = n & 1
            accs[k] = tap if accs[k] is None else accs[k] + tap
        return accs[0] + accs[1]

    def kernel(x_ref, w1ta_ref, w1tb_ref, b1a_ref, b1b_ref,
               w3_ref, b3_ref, w5_ref, b5_ref, w2t_ref, b2_ref,
               mask_ref, o_ref, cat_ref):
        x = x_ref[...]                                                # (c1, HW)

        # ---- cv1 (1x1, BN scale folded into weights), split per branch so each
        # depthwise branch works on exactly its own channels ----
        y1a = _silu(jnp.dot(w1ta_ref[...], x,
                            preferred_element_type=jnp.float32) + b1a_ref[...])
        y1b = _silu(jnp.dot(w1tb_ref[...], x,
                            preferred_element_type=jnp.float32) + b1b_ref[...])
        # stage the x1 rows of the final-matmul operand early (overlaps tap loops)
        cat_ref[0:mc2, :] = y1a
        cat_ref[mc2:min_ch, :] = y1b

        # ---- depthwise: 3x3 on the first half, 5x5 on the second half ----
        o3 = _silu(tap_loop(y1a, mask_ref, w3_ref[...], OFFS3,
                            lambda dy, dx: (dy + 1) * 3 + (dx + 1)) + b3_ref[...])
        o5 = _silu(tap_loop(y1b, mask_ref, w5_ref[...], OFFS5,
                            lambda dy, dx: (dy + 2) * 5 + (dx + 2)) + b5_ref[...])
        cat_ref[min_ch:min_ch + mc2, :] = o3
        cat_ref[min_ch + mc2:, :] = o5

        # ---- final 1x1: single K=c2 MXU pass over the VMEM-staged operand ----
        z = jnp.dot(w2t_ref[...], cat_ref[...],
                    preferred_element_type=jnp.float32)
        o_ref[...] = _silu(z + b2_ref[...])                           # lane-dense store

    return kernel


def prepare_kernel_params(params):
    """Fold BN scales into weights; split cv1 per depthwise branch."""
    w1, s1, b1, w3, s3, b3, w5, s5, b5, w2, s2, b2 = params
    c1, min_ch = w1.shape
    mc2 = min_ch // 2
    col = lambda v: v[:, None].astype(jnp.float32)

    w1t = (w1.T * s1[:, None]).astype(jnp.float32)                    # (min_ch, c1)
    w3f = (w3.T * s3[:, None]).astype(jnp.float32)                    # (mc2, 9)
    w5f = (w5.T * s5[:, None]).astype(jnp.float32)                    # (mc2, 25)
    w2t = (w2.T * s2[:, None]).astype(jnp.float32)                    # (c2, c2)

    return (w1t[:mc2], w1t[mc2:], col(b1[:mc2]), col(b1[mc2:]),
            w3f, col(b3), w5f, col(b5), w2t, col(b2))


def _build_tap_masks(H, W):
    """(25, H*W) validity masks, row t = (dy+2)*5+(dx+2); 1.0 where the (dy,dx)
    neighbour is inside the image.  Passed with a constant index_map so it is
    DMA'd once and reused by every grid step."""
    n = jnp.arange(H * W, dtype=jnp.int32)
    h, w = n // W, n % W
    rows = []
    for dy, dx in OFFS5:
        rows.append((h + dy >= 0) & (h + dy < H) & (w + dx >= 0) & (w + dx < W))
    return jnp.stack(rows).astype(jnp.float32)


def _vmem_limit_bytes(c1, c2, hw):
    # double-buffered x/out blocks + mask slab + staged operand + live f32 temps
    est = 4 * hw * (2 * c1 + 2 * c2 + 2 * 25 + c2 + 6 * (c2 // 2)) + (2 << 20)
    # raise v5e's 16 MiB scoped default, stay well under v7x's 64 MiB physical
    return int(min(max(est, 32 << 20), 48 << 20))


def msgconv_forward(x_nchw, params):
    B, c1, H, W = x_nchw.shape
    c2 = params[9].shape[1]
    HW = H * W

    kp = prepare_kernel_params(params)
    masks = _build_tap_masks(H, W)
    x3 = x_nchw.reshape(B, c1, HW).astype(jnp.float32)    # free reshape, no HBM transpose

    kernel = _make_kernel(H, W, c1, c2)
    const = lambda p: pl.BlockSpec(p.shape, lambda b: (0, 0))   # params/masks DMA'd once

    out = pl.pallas_call(
        kernel,
        out_shape=jax.ShapeDtypeStruct((B, c2, HW), jnp.float32),
        grid_spec=pltpu.PrefetchScalarGridSpec(
            num_scalar_prefetch=0,
            grid=(B,),                                      # one image per step (>=2 steps)
            in_specs=[pl.BlockSpec((pl.Squeezed(), c1, HW), lambda b: (b, 0, 0))]
                     + [const(p) for p in kp] + [const(masks)],
            out_specs=pl.BlockSpec((pl.Squeezed(), c2, HW), lambda b: (b, 0, 0)),
            scratch_shapes=[pltpu.VMEM((c2, HW), jnp.float32)],   # stacked 1x1 operand
        ),
        compiler_params=pltpu.CompilerParams(
            dimension_semantics=("parallel",),              # images shard across v7x TCs
            vmem_limit_bytes=_vmem_limit_bytes(c1, c2, HW)),
    )(x3, *kp, masks)
    return out.reshape(B, c2, H, W)                         # free reshape back to NCHW


# --------------------------- reference & test ---------------------------

def _fold_bn(gamma, beta, mean, var, eps=1e-5):
    scale = gamma / jnp.sqrt(var + eps)
    bias = beta - mean * scale
    return scale, bias


def init_params(key, c1, c2):
    min_ch = c2 // 2
    mc2 = min_ch // 2
    ks = jax.random.split(key, 8)

    def bn(k, c):
        kg, kb, km, kv = jax.random.split(k, 4)
        gamma = 1.0 + 0.1 * jax.random.normal(kg, (c,), jnp.float32)
        beta = 0.1 * jax.random.normal(kb, (c,), jnp.float32)
        mean = 0.1 * jax.random.normal(km, (c,), jnp.float32)
        var = 1.0 + 0.1 * jax.random.uniform(kv, (c,), jnp.float32)
        return _fold_bn(gamma, beta, mean, var)

    w1 = 0.3 * jax.random.normal(ks[0], (c1, min_ch), jnp.float32)   # y = x @ w1
    s1, b1 = bn(ks[1], min_ch)
    w3 = 0.3 * jax.random.normal(ks[2], (9, mc2), jnp.float32)       # depthwise 3x3
    s3, b3 = bn(ks[3], mc2)
    w5 = 0.3 * jax.random.normal(ks[4], (25, mc2), jnp.float32)      # depthwise 5x5
    s5, b5 = bn(ks[5], mc2)
    w2 = 0.3 * jax.random.normal(ks[6], (c2, c2), jnp.float32)       # final 1x1
    s2, b2 = bn(ks[7], c2)
    return (w1, s1, b1, w3, s3, b3, w5, s5, b5, w2, s2, b2)


def reference(x_nchw, params):
    """Pure-JAX reference (independent of the kernel code paths), NCHW in/out."""
    w1, s1, b1, w3, s3, b3, w5, s5, b5, w2, s2, b2 = params
    B, c1, H, W = x_nchw.shape
    min_ch = w1.shape[1]
    mc2 = min_ch // 2

    def bn(v, s, b):
        return v * s[None, :, None, None] + b[None, :, None, None]

    def dwconv(inp, wf, k):
        p = k // 2
        xp = jnp.pad(inp, ((0, 0), (0, 0), (p, p), (p, p)))
        acc = jnp.zeros_like(inp)
        for dy in range(k):
            for dx in range(k):
                acc = acc + xp[:, :, dy:dy + H, dx:dx + W] * wf[dy * k + dx][None, :, None, None]
        return acc

    y1 = _silu(bn(jnp.einsum('bchw,cd->bdhw', x_nchw, w1), s1, b1))
    o3 = _silu(bn(dwconv(y1[:, :mc2], w3, 3), s3, b3))
    o5 = _silu(bn(dwconv(y1[:, mc2:], w5, 5), s5, b5))
    cat = jnp.concatenate([y1, o3, o5], axis=1)
    return _silu(bn(jnp.einsum('bchw,cd->bdhw', cat, w2), s2, b2))


if __name__ == "__main__":
    key = jax.random.PRNGKey(0)
    kx, kparams = jax.random.split(key)

    B, C1, Hs, Ws = 2, 4, 16, 16      # PyTorch NCHW input shape
    C2 = 8                            # MSGConv(c1=4, c2=8, k=1, s=1, kernels=[3, 5])

    x_nchw = jax.random.normal(kx, (B, C1, Hs, Ws), jnp.float32)
    params = init_params(kparams, C1, C2)

    out = msgconv_forward(x_nchw, params)
    out = jax.block_until_ready(out)

    ref = reference(x_nchw, params)
    assert out.shape == (B, C2, Hs, Ws)
    assert jnp.allclose(out, ref, rtol=1e-3, atol=1e-3), "kernel mismatch vs reference"

    print("KERNEL_OK")
</pallas_src>

<mosaic_0001>
module attributes {stable_mosaic.version = 11 : i64} {
  func.func @kernel(%arg0: i32, %arg1: memref<1x4x256xf32, #tpu.memory_space<vmem>>, %arg2: memref<2x4xf32, #tpu.memory_space<vmem>>, %arg3: memref<2x4xf32, #tpu.memory_space<vmem>>, %arg4: memref<2x1xf32, #tpu.memory_space<vmem>>, %arg5: memref<2x1xf32, #tpu.memory_space<vmem>>, %arg6: memref<2x9xf32, #tpu.memory_space<vmem>>, %arg7: memref<2x1xf32, #tpu.memory_space<vmem>>, %arg8: memref<2x25xf32, #tpu.memory_space<vmem>>, %arg9: memref<2x1xf32, #tpu.memory_space<vmem>>, %arg10: memref<8x8xf32, #tpu.memory_space<vmem>>, %arg11: memref<8x1xf32, #tpu.memory_space<vmem>>, %arg12: memref<25x256xf32, #tpu.memory_space<vmem>>, %arg13: memref<1x8x256xf32, #tpu.memory_space<vmem>>, %arg14: memref<8x256xf32, #tpu.memory_space<vmem>>) attributes {dimension_semantics = [#tpu.dimension_semantics<parallel>], iteration_bounds = array<i64: 2>, scalar_prefetch = 0 : i64, scratch_operands = 1 : i64, tpu.core_type = #tpu.core_type<tc>, window_params = [{transform_indices = @transform_0, window_bounds = array<i64: 1, 4, 256>}, {pipeline_mode = #tpu.pipeline_mode<synchronous>, transform_indices = @transform_1, window_bounds = array<i64: 2, 4>}, {pipeline_mode = #tpu.pipeline_mode<synchronous>, transform_indices = @transform_2, window_bounds = array<i64: 2, 4>}, {pipeline_mode = #tpu.pipeline_mode<synchronous>, transform_indices = @transform_3, window_bounds = array<i64: 2, 1>}, {pipeline_mode = #tpu.pipeline_mode<synchronous>, transform_indices = @transform_4, window_bounds = array<i64: 2, 1>}, {pipeline_mode = #tpu.pipeline_mode<synchronous>, transform_indices = @transform_5, window_bounds = array<i64: 2, 9>}, {pipeline_mode = #tpu.pipeline_mode<synchronous>, transform_indices = @transform_6, window_bounds = array<i64: 2, 1>}, {pipeline_mode = #tpu.pipeline_mode<synchronous>, transform_indices = @transform_7, window_bounds = array<i64: 2, 25>}, {pipeline_mode = #tpu.pipeline_mode<synchronous>, transform_indices = @transform_8, window_bounds = array<i64: 2, 1>}, {pipeline_mode = #tpu.pipeline_mode<synchronous>, transform_indices = @transform_9, window_bounds = array<i64: 8, 8>}, {pipeline_mode = #tpu.pipeline_mode<synchronous>, transform_indices = @transform_10, window_bounds = array<i64: 8, 1>}, {pipeline_mode = #tpu.pipeline_mode<synchronous>, transform_indices = @transform_11, window_bounds = array<i64: 25, 256>}, {transform_indices = @transform_12, window_bounds = array<i64: 1, 8, 256>}]} {
    %c0 = arith.constant 0 : index
    %c0_0 = arith.constant 0 : index
    %c0_1 = arith.constant 0 : index
    %0 = vector.load %arg1[%c0, %c0_0, %c0_1] : memref<1x4x256xf32, #tpu.memory_space<vmem>>, vector<1x4x256xf32>
    %1 = vector.shape_cast %0 : vector<1x4x256xf32> to vector<4x256xf32>
    %c0_2 = arith.constant 0 : index
    %c0_3 = arith.constant 0 : index
    %2 = vector.load %arg2[%c0_2, %c0_3] : memref<2x4xf32, #tpu.memory_space<vmem>>, vector<2x4xf32>
    %cst = arith.constant dense<0.000000e+00> : vector<2x256xf32>
    %3 = tpu.matmul %2, %1, %cst {dimension_numbers = #tpu.dot_dimension_numbers<[1], [0], [0], [1], [0, 0, 1, 1], [], []>} : vector<2x4xf32>, vector<4x256xf32>, vector<2x256xf32> -> vector<2x256xf32>
    %c0_4 = arith.constant 0 : index
    %c0_5 = arith.constant 0 : index
    %4 = vector.load %arg4[%c0_4, %c0_5] : memref<2x1xf32, #tpu.memory_space<vmem>>, vector<2x1xf32>
    %5 = vector.broadcast %4 : vector<2x1xf32> to vector<2x256xf32>
    %6 = arith.addf %3, %5 : vector<2x256xf32>
    %7 = arith.negf %6 : vector<2x256xf32>
    %8 = math.exp %7 : vector<2x256xf32>
    %cst_6 = arith.constant 1.000000e+00 : f32
    %9 = vector.broadcast %cst_6 : f32 to vector<2x256xf32>
    %10 = arith.addf %9, %8 : vector<2x256xf32>
    %11 = arith.divf %9, %10 : vector<2x256xf32>
    %12 = arith.mulf %6, %11 : vector<2x256xf32>
    %c0_7 = arith.constant 0 : index
    %c0_8 = arith.constant 0 : index
    %13 = vector.load %arg3[%c0_7, %c0_8] : memref<2x4xf32, #tpu.memory_space<vmem>>, vector<2x4xf32>
    %cst_9 = arith.constant dense<0.000000e+00> : vector<2x256xf32>
    %14 = tpu.matmul %13, %1, %cst_9 {dimension_numbers = #tpu.dot_dimension_numbers<[1], [0], [0], [1], [0, 0, 1, 1], [], []>} : vector<2x4xf32>, vector<4x256xf32>, vector<2x256xf32> -> vector<2x256xf32>
    %c0_10 = arith.constant 0 : index
    %c0_11 = arith.constant 0 : index
    %15 = vector.load %arg5[%c0_10, %c0_11] : memref<2x1xf32, #tpu.memory_space<vmem>>, vector<2x1xf32>
    %16 = vector.broadcast %15 : vector<2x1xf32> to vector<2x256xf32>
    %17 = arith.addf %14, %16 : vector<2x256xf32>
    %18 = arith.negf %17 : vector<2x256xf32>
    %19 = math.exp %18 : vector<2x256xf32>
    %cst_12 = arith.constant 1.000000e+00 : f32
    %20 = vector.broadcast %cst_12 : f32 to vector<2x256xf32>
    %21 = arith.addf %20, %19 : vector<2x256xf32>
    %22 = arith.divf %20, %21 : vector<2x256xf32>
    %23 = arith.mulf %17, %22 : vector<2x256xf32>
    %c0_13 = arith.constant 0 : index
    %c0_14 = arith.constant 0 : index
    %24 = vector.load %arg14[%c0_13, %c0_14] : memref<8x256xf32, #tpu.memory_space<vmem>>, vector<2x256xf32>
    tpu.vector_store %arg14[%c0_13, %c0_14], %12 {strides = array<i32>} : memref<8x256xf32, #tpu.memory_space<vmem>>, vector<2x256xf32>,
    %c2 = arith.constant 2 : index
    %c0_15 = arith.constant 0 : index
    %25 = vector.load %arg14[%c2, %c0_15] : memref<8x256xf32, #tpu.memory_space<vmem>>, vector<2x256xf32>
    tpu.vector_store %arg14[%c2, %c0_15], %23 {strides = array<i32>} : memref<8x256xf32, #tpu.memory_space<vmem>>, vector<2x256xf32>,
    %c0_16 = arith.constant 0 : index
    %c0_17 = arith.constant 0 : index
    %26 = vector.load %arg6[%c0_16, %c0_17] : memref<2x9xf32, #tpu.memory_space<vmem>>, vector<2x9xf32>
    %27 = vector.extract_strided_slice %26 {offsets = [0, 0], sizes = [2, 1], strides = [1, 1]} : vector<2x9xf32> to vector<2x1xf32>
    %c17_i32 = arith.constant 17 : i32
    %28 = tpu.dynamic_rotate %12 by %c17_i32 dim 1 : vector<2x256xf32>, i32 -> vector<2x256xf32>
    %c6 = arith.constant 6 : index
    %c0_18 = arith.constant 0 : index
    %29 = vector.load %arg12[%c6, %c0_18] : memref<25x256xf32, #tpu.memory_space<vmem>>, vector<1x256xf32>
    %30 = vector.broadcast %29 : vector<1x256xf32> to vector<2x256xf32>
    %31 = arith.mulf %28, %30 : vector<2x256xf32>
    %32 = vector.broadcast %27 : vector<2x1xf32> to vector<2x256xf32>
    %33 = arith.mulf %31, %32 : vector<2x256xf32>
    %34 = vector.extract_strided_slice %26 {offsets = [0, 1], sizes = [2, 1], strides = [1, 1]} : vector<2x9xf32> to vector<2x1xf32>
    %c16_i32 = arith.constant 16 : i32
    %35 = tpu.dynamic_rotate %12 by %c16_i32 dim 1 : vector<2x256xf32>, i32 -> vector<2x256xf32>
    %c7 = arith.constant 7 : index
    %c0_19 = arith.constant 0 : index
    %36 = vector.load %arg12[%c7, %c0_19] : memref<25x256xf32, #tpu.memory_space<vmem>>, vector<1x256xf32>
    %37 = vector.broadcast %36 : vector<1x256xf32> to vector<2x256xf32>
    %38 = arith.mulf %35, %37 : vector<2x256xf32>
    %39 = vector.broadcast %34 : vector<2x1xf32> to vector<2x256xf32>
    %40 = arith.mulf %38, %39 : vector<2x256xf32>
    %41 = vector.extract_strided_slice %26 {offsets = [0, 2], sizes = [2, 1], strides = [1, 1]} : vector<2x9xf32> to vector<2x1xf32>
    %c15_i32 = arith.constant 15 : i32
    %42 = tpu.dynamic_rotate %12 by %c15_i32 dim 1 : vector<2x256xf32>, i32 -> vector<2x256xf32>
    %c8 = arith.constant 8 : index
    %c0_20 = arith.constant 0 : index
    %43 = vector.load %arg12[%c8, %c0_20] : memref<25x256xf32, #tpu.memory_space<vmem>>, vector<1x256xf32>
    %44 = vector.broadcast %43 : vector<1x256xf32> to vector<2x256xf32>
    %45 = arith.mulf %42, %44 : vector<2x256xf32>
    %46 = vector.broadcast %41 : vector<2x1xf32> to vector<2x256xf32>
    %47 = arith.mulf %45, %46 : vector<2x256xf32>
    %48 = arith.addf %33, %47 : vector<2x256xf32>
    %49 = vector.extract_strided_slice %26 {offsets = [0, 3], sizes = [2, 1], strides = [1, 1]} : vector<2x9xf32> to vector<2x1xf32>
    %c1_i32 = arith.constant 1 : i32
    %50 = tpu.dynamic_rotate %12 by %c1_i32 dim 1 : vector<2x256xf32>, i32 -> vector<2x256xf32>
    %c11 = arith.constant 11 : index
    %c0_21 = arith.constant 0 : index
    %51 = vector.load %arg12[%c11, %c0_21] : memref<25x256xf32, #tpu.memory_space<vmem>>, vector<1x256xf32>
    %52 = vector.broadcast %51 : vector<1x256xf32> to vector<2x256xf32>
    %53 = arith.mulf %50, %52 : vector<2x256xf32>
    %54 = vector.broadcast %49 : vector<2x1xf32> to vector<2x256xf32>
    %55 = arith.mulf %53, %54 : vector<2x256xf32>
    %56 = arith.addf %40, %55 : vector<2x256xf32>
    %57 = vector.extract_strided_slice %26 {offsets = [0, 4], sizes = [2, 1], strides = [1, 1]} : vector<2x9xf32> to vector<2x1xf32>
    %58 = vector.broadcast %57 : vector<2x1xf32> to vector<2x256xf32>
    %59 = arith.mulf %12, %58 : vector<2x256xf32>
    %60 = arith.addf %48, %59 : vector<2x256xf32>
    %61 = vector.extract_strided_slice %26 {offsets = [0, 5], sizes = [2, 1], strides = [1, 1]} : vector<2x9xf32> to vector<2x1xf32>
    %c255_i32 = arith.constant 255 : i32
    %62 = tpu.dynamic_rotate %12 by %c255_i32 dim 1 : vector<2x256xf32>, i32 -> vector<2x256xf32>
    %c13 = arith.constant 13 : index
    %c0_22 = arith.constant 0 : index
    %63 = vector.load %arg12[%c13, %c0_22] : memref<25x256xf32, #tpu.memory_space<vmem>>, vector<1x256xf32>
    %64 = vector.broadcast %63 : vector<1x256xf32> to vector<2x256xf32>
    %65 = arith.mulf %62, %64 : vector<2x256xf32>
    %66 = vector.broadcast %61 : vector<2x1xf32> to vector<2x256xf32>
    %67 = arith.mulf %65, %66 : vector<2x256xf32>
    %68 = arith.addf %56, %67 : vector<2x256xf32>
    %69 = vector.extract_strided_slice %26 {offsets = [0, 6], sizes = [2, 1], strides = [1, 1]} : vector<2x9xf32> to vector<2x1xf32>
    %c241_i32 = arith.constant 241 : i32
    %70 = tpu.dynamic_rotate %12 by %c241_i32 dim 1 : vector<2x256xf32>, i32 -> vector<2x256xf32>
    %c16 = arith.constant 16 : index
    %c0_23 = arith.constant 0 : index
    %71 = vector.load %arg12[%c16, %c0_23] : memref<25x256xf32, #tpu.memory_space<vmem>>, vector<1x256xf32>
    %72 = vector.broadcast %71 : vector<1x256xf32> to vector<2x256xf32>
    %73 = arith.mulf %70, %72 : vector<2x256xf32>
    %74 = vector.broadcast %69 : vector<2x1xf32> to vector<2x256xf32>
    %75 = arith.mulf %73, %74 : vector<2x256xf32>
    %76 = arith.addf %60, %75 : vector<2x256xf32>
    %77 = vector.extract_strided_slice %26 {offsets = [0, 7], sizes = [2, 1], strides = [1, 1]} : vector<2x9xf32> to vector<2x1xf32>
    %c240_i32 = arith.constant 240 : i32
    %78 = tpu.dynamic_rotate %12 by %c240_i32 dim 1 : vector<2x256xf32>, i32 -> vector<2x256xf32>
    %c17 = arith.constant 17 : index
    %c0_24 = arith.constant 0 : index
    %79 = vector.load %arg12[%c17, %c0_24] : memref<25x256xf32, #tpu.memory_space<vmem>>, vector<1x256xf32>
    %80 = vector.broadcast %79 : vector<1x256xf32> to vector<2x256xf32>
    %81 = arith.mulf %78, %80 : vector<2x256xf32>
    %82 = vector.broadcast %77 : vector<2x1xf32> to vector<2x256xf32>
    %83 = arith.mulf %81, %82 : vector<2x256xf32>
    %84 = arith.addf %68, %83 : vector<2x256xf32>
    %85 = vector.extract_strided_slice %26 {offsets = [0, 8], sizes = [2, 1], strides = [1, 1]} : vector<2x9xf32> to vector<2x1xf32>
    %c239_i32 = arith.constant 239 : i32
    %86 = tpu.dynamic_rotate %12 by %c239_i32 dim 1 : vector<2x256xf32>, i32 -> vector<2x256xf32>
    %c18 = arith.constant 18 : index
    %c0_25 = arith.constant 0 : index
    %87 = vector.load %arg12[%c18, %c0_25] : memref<25x256xf32, #tpu.memory_space<vmem>>, vector<1x256xf32>
    %88 = vector.broadcast %87 : vector<1x256xf32> to vector<2x256xf32>
    %89 = arith.mulf %86, %88 : vector<2x256xf32>
    %90 = vector.broadcast %85 : vector<2x1xf32> to vector<2x256xf32>
    %91 = arith.mulf %89, %90 : vector<2x256xf32>
    %92 = arith.addf %76, %91 : vector<2x256xf32>
    %93 = arith.addf %92, %84 : vector<2x256xf32>
    %c0_26 = arith.constant 0 : index
    %c0_27 = arith.constant 0 : index
    %94 = vector.load %arg7[%c0_26, %c0_27] : memref<2x1xf32, #tpu.memory_space<vmem>>, vector<2x1xf32>
    %95 = vector.broadcast %94 : vector<2x1xf32> to vector<2x256xf32>
    %96 = arith.addf %93, %95 : vector<2x256xf32>
    %97 = arith.negf %96 : vector<2x256xf32>
    %98 = math.exp %97 : vector<2x256xf32>
    %cst_28 = arith.constant 1.000000e+00 : f32
    %99 = vector.broadcast %cst_28 : f32 to vector<2x256xf32>
    %100 = arith.addf %99, %98 : vector<2x256xf32>
    %101 = arith.divf %99, %100 : vector<2x256xf32>
    %102 = arith.mulf %96, %101 : vector<2x256xf32>
    %c0_29 = arith.constant 0 : index
    %c0_30 = arith.constant 0 : index
    %103 = vector.load %arg8[%c0_29, %c0_30] : memref<2x25xf32, #tpu.memory_space<vmem>>, vector<2x25xf32>
    %104 = vector.extract_strided_slice %103 {offsets = [0, 0], sizes = [2, 1], strides = [1, 1]} : vector<2x25xf32> to vector<2x1xf32>
    %c34_i32 = arith.constant 34 : i32
    %105 = tpu.dynamic_rotate %23 by %c34_i32 dim 1 : vector<2x256xf32>, i32 -> vector<2x256xf32>
    %c0_31 = arith.constant 0 : index
    %c0_32 = arith.constant 0 : index
    %106 = vector.load %arg12[%c0_31, %c0_32] : memref<25x256xf32, #tpu.memory_space<vmem>>, vector<1x256xf32>
    %107 = vector.broadcast %106 : vector<1x256xf32> to vector<2x256xf32>
    %108 = arith.mulf %105, %107 : vector<2x256xf32>
    %109 = vector.broadcast %104 : vector<2x1xf32> to vector<2x256xf32>
    %110 = arith.mulf %108, %109 : vector<2x256xf32>
    %111 = vector.extract_strided_slice %103 {offsets = [0, 1], sizes = [2, 1], strides = [1, 1]} : vector<2x25xf32> to vector<2x1xf32>
    %c33_i32 = arith.constant 33 : i32
    %112 = tpu.dynamic_rotate %23 by %c33_i32 dim 1 : vector<2x256xf32>, i32 -> vector<2x256xf32>
    %c1 = arith.constant 1 : index
    %c0_33 = arith.constant 0 : index
    %113 = vector.load %arg12[%c1, %c0_33] : memref<25x256xf32, #tpu.memory_space<vmem>>, vector<1x256xf32>
    %114 = vector.broadcast %113 : vector<1x256xf32> to vector<2x256xf32>
    %115 = arith.mulf %112, %114 : vector<2x256xf32>
    %116 = vector.broadcast %111 : vector<2x1xf32> to vector<2x256xf32>
    %117 = arith.mulf %115, %116 : vector<2x256xf32>
    %118 = vector.extract_strided_slice %103 {offsets = [0, 2], sizes = [2, 1], strides = [1, 1]} : vector<2x25xf32> to vector<2x1xf32>
    %c32_i32 = arith.constant 32 : i32
    %119 = tpu.dynamic_rotate %23 by %c32_i32 dim 1 : vector<2x256xf32>, i32 -> vector<2x256xf32>
    %c2_34 = arith.constant 2 : index
    %c0_35 = arith.constant 0 : index
    %120 = vector.load %arg12[%c2_34, %c0_35] : memref<25x256xf32, #tpu.memory_space<vmem>>, vector<1x256xf32>
    %121 = vector.broadcast %120 : vector<1x256xf32> to vector<2x256xf32>
    %122 = arith.mulf %119, %121 : vector<2x256xf32>
    %123 = vector.broadcast %118 : vector<2x1xf32> to vector<2x256xf32>
    %124 = arith.mulf %122, %123 : vector<2x256xf32>
    %125 = arith.addf %110, %124 : vector<2x256xf32>
    %126 = vector.extract_strided_slice %103 {offsets = [0, 3], sizes = [2, 1], strides = [1, 1]} : vector<2x25xf32> to vector<2x1xf32>
    %c31_i32 = arith.constant 31 : i32
    %127 = tpu.dynamic_rotate %23 by %c31_i32 dim 1 : vector<2x256xf32>, i32 -> vector<2x256xf32>
    %c3 = arith.constant 3 : index
    %c0_36 = arith.constant 0 : index
    %128 = vector.load %arg12[%c3, %c0_36] : memref<25x256xf32, #tpu.memory_space<vmem>>, vector<1x256xf32>
    %129 = vector.broadcast %128 : vector<1x256xf32> to vector<2x256xf32>
    %130 = arith.mulf %127, %129 : vector<2x256xf32>
    %131 = vector.broadcast %126 : vector<2x1xf32> to vector<2x256xf32>
    %132 = arith.mulf %130, %131 : vector<2x256xf32>
    %133 = arith.addf %117, %132 : vector<2x256xf32>
    %134 = vector.extract_strided_slice %103 {offsets = [0, 4], sizes = [2, 1], strides = [1, 1]} : vector<2x25xf32> to vector<2x1xf32>
    %c30_i32 = arith.constant 30 : i32
    %135 = tpu.dynamic_rotate %23 by %c30_i32 dim 1 : vector<2x256xf32>, i32 -> vector<2x256xf32>
    %c4 = arith.constant 4 : index
    %c0_37 = arith.constant 0 : index
    %136 = vector.load %arg12[%c4, %c0_37] : memref<25x256xf32, #tpu.memory_space<vmem>>, vector<1x256xf32>
    %137 = vector.broadcast %136 : vector<1x256xf32> to vector<2x256xf32>
    %138 = arith.mulf %135, %137 : vector<2x256xf32>
    %139 = vector.broadcast %134 : vector<2x1xf32> to vector<2x256xf32>
    %140 = arith.mulf %138, %139 : vector<2x256xf32>
    %141 = arith.addf %125, %140 : vector<2x256xf32>
    %142 = vector.extract_strided_slice %103 {offsets = [0, 5], sizes = [2, 1], strides = [1, 1]} : vector<2x25xf32> to vector<2x1xf32>
    %c18_i32 = arith.constant 18 : i32
    %143 = tpu.dynamic_rotate %23 by %c18_i32 dim 1 : vector<2x256xf32>, i32 -> vector<2x256xf32>
    %c5 = arith.constant 5 : index
    %c0_38 = arith.constant 0 : index
    %144 = vector.load %arg12[%c5, %c0_38] : memref<25x256xf32, #tpu.memory_space<vmem>>, vector<1x256xf32>
    %145 = vector.broadcast %144 : vector<1x256xf32> to vector<2x256xf32>
    %146 = arith.mulf %143, %145 : vector<2x256xf32>
    %147 = vector.broadcast %142 : vector<2x1xf32> to vector<2x256xf32>
    %148 = arith.mulf %146, %147 : vector<2x256xf32>
    %149 = arith.addf %133, %148 : vector<2x256xf32>
    %150 = vector.extract_strided_slice %103 {offsets = [0, 6], sizes = [2, 1], strides = [1, 1]} : vector<2x25xf32> to vector<2x1xf32>
    %c17_i32_39 = arith.constant 17 : i32
    %151 = tpu.dynamic_rotate %23 by %c17_i32_39 dim 1 : vector<2x256xf32>, i32 -> vector<2x256xf32>
    %c6_40 = arith.constant 6 : index
    %c0_41 = arith.constant 0 : index
    %152 = vector.load %arg12[%c6_40, %c0_41] : memref<25x256xf32, #tpu.memory_space<vmem>>, vector<1x256xf32>
    %153 = vector.broadcast %152 : vector<1x256xf32> to vector<2x256xf32>
    %154 = arith.mulf %151, %153 : vector<2x256xf32>
    %155 = vector.broadcast %150 : vector<2x1xf32> to vector<2x256xf32>
    %156 = arith.mulf %154, %155 : vector<2x256xf32>
    %157 = arith.addf %141, %156 : vector<2x256xf32>
    %158 = vector.extract_strided_slice %103 {offsets = [0, 7], sizes = [2, 1], strides = [1, 1]} : vector<2x25xf32> to vector<2x1xf32>
    %c16_i32_42 = arith.constant 16 : i32
    %159 = tpu.dynamic_rotate %23 by %c16_i32_42 dim 1 : vector<2x256xf32>, i32 -> vector<2x256xf32>
    %c7_43 = arith.constant 7 : index
    %c0_44 = arith.constant 0 : index
    %160 = vector.load %arg12[%c7_43, %c0_44] : memref<25x256xf32, #tpu.memory_space<vmem>>, vector<1x256xf32>
    %161 = vector.broadcast %160 : vector<1x256xf32> to vector<2x256xf32>
    %162 = arith.mulf %159, %161 : vector<2x256xf32>
    %163 = vector.broadcast %158 : vector<2x1xf32> to vector<2x256xf32>
    %164 = arith.mulf %162, %163 : vector<2x256xf32>
    %165 = arith.addf %149, %164 : vector<2x256xf32>
    %166 = vector.extract_strided_slice %103 {offsets = [0, 8], sizes = [2, 1], strides = [1, 1]} : vector<2x25xf32> to vector<2x1xf32>
    %c15_i32_45 = arith.constant 15 : i32
    %167 = tpu.dynamic_rotate %23 by %c15_i32_45 dim 1 : vector<2x256xf32>, i32 -> vector<2x256xf32>
    %c8_46 = arith.constant 8 : index
    %c0_47 = arith.constant 0 : index
    %168 = vector.load %arg12[%c8_46, %c0_47] : memref<25x256xf32, #tpu.memory_space<vmem>>, vector<1x256xf32>
    %169 = vector.broadcast %168 : vector<1x256xf32> to vector<2x256xf32>
    %170 = arith.mulf %167, %169 : vector<2x256xf32>
    %171 = vector.broadcast %166 : vector<2x1xf32> to vector<2x256xf32>
    %172 = arith.mulf %170, %171 : vector<2x256xf32>
    %173 = arith.addf %157, %172 : vector<2x256xf32>
    %174 = vector.extract_strided_slice %103 {offsets = [0, 9], sizes = [2, 1], strides = [1, 1]} : vector<2x25xf32> to vector<2x1xf32>
    %c14_i32 = arith.constant 14 : i32
    %175 = tpu.dynamic_rotate %23 by %c14_i32 dim 1 : vector<2x256xf32>, i32 -> vector<2x256xf32>
    %c9 = arith.constant 9 : index
    %c0_48 = arith.constant 0 : index
    %176 = vector.load %arg12[%c9, %c0_48] : memref<25x256xf32, #tpu.memory_space<vmem>>, vector<1x256xf32>
    %177 = vector.broadcast %176 : vector<1x256xf32> to vector<2x256xf32>
    %178 = arith.mulf %175, %177 : vector<2x256xf32>
    %179 = vector.broadcast %174 : vector<2x1xf32> to vector<2x256xf32>
    %180 = arith.mulf %178, %179 : vector<2x256xf32>
    %181 = arith.addf %165, %180 : vector<2x256xf32>
    %182 = vector.extract_strided_slice %103 {offsets = [0, 10], sizes = [2, 1], strides = [1, 1]} : vector<2x25xf32> to vector<2x1xf32>
    %c2_i32 = arith.constant 2 : i32
    %183 = tpu.dynamic_rotate %23 by %c2_i32 dim 1 : vector<2x256xf32>, i32 -> vector<2x256xf32>
    %c10 = arith.constant 10 : index
    %c0_49 = arith.constant 0 : index
    %184 = vector.load %arg12[%c10, %c0_49] : memref<25x256xf32, #tpu.memory_space<vmem>>, vector<1x256xf32>
    %185 = vector.broadcast %184 : vector<1x256xf32> to vector<2x256xf32>
    %186 = arith.mulf %183, %185 : vector<2x256xf32>
    %187 = vector.broadcast %182 : vector<2x1xf32> to vector<2x256xf32>
    %188 = arith.mulf %186, %187 : vector<2x256xf32>
    %189 = arith.addf %173, %188 : vector<2x256xf32>
    %190 = vector.extract_strided_slice %103 {offsets = [0, 11], sizes = [2, 1], strides = [1, 1]} : vector<2x25xf32> to vector<2x1xf32>
    %c1_i32_50 = arith.constant 1 : i32
    %191 = tpu.dynamic_rotate %23 by %c1_i32_50 dim 1 : vector<2x256xf32>, i32 -> vector<2x256xf32>
    %c11_51 = arith.constant 11 : index
    %c0_52 = arith.constant 0 : index
    %192 = vector.load %arg12[%c11_51, %c0_52] : memref<25x256xf32, #tpu.memory_space<vmem>>, vector<1x256xf32>
    %193 = vector.broadcast %192 : vector<1x256xf32> to vector<2x256xf32>
    %194 = arith.mulf %191, %193 : vector<2x256xf32>
    %195 = vector.broadcast %190 : vector<2x1xf32> to vector<2x256xf32>
    %196 = arith.mulf %194, %195 : vector<2x256xf32>
    %197 = arith.addf %181, %196 : vector<2x256xf32>
    %198 = vector.extract_strided_slice %103 {offsets = [0, 12], sizes = [2, 1], strides = [1, 1]} : vector<2x25xf32> to vector<2x1xf32>
    %199 = vector.broadcast %198 : vector<2x1xf32> to vector<2x256xf32>
    %200 = arith.mulf %23, %199 : vector<2x256xf32>
    %201 = arith.addf %189, %200 : vector<2x256xf32>
    %202 = vector.extract_strided_slice %103 {offsets = [0, 13], sizes = [2, 1], strides = [1, 1]} : vector<2x25xf32> to vector<2x1xf32>
    %c255_i32_53 = arith.constant 255 : i32
    %203 = tpu.dynamic_rotate %23 by %c255_i32_53 dim 1 : vector<2x256xf32>, i32 -> vector<2x256xf32>
    %c13_54 = arith.constant 13 : index
    %c0_55 = arith.constant 0 : index
    %204 = vector.load %arg12[%c13_54, %c0_55] : memref<25x256xf32, #tpu.memory_space<vmem>>, vector<1x256xf32>
    %205 = vector.broadcast %204 : vector<1x256xf32> to vector<2x256xf32>
    %206 = arith.mulf %203, %205 : vector<2x256xf32>
    %207 = vector.broadcast %202 : vector<2x1xf32> to vector<2x256xf32>
    %208 = arith.mulf %206, %207 : vector<2x256xf32>
    %209 = arith.addf %197, %208 : vector<2x256xf32>
    %210 = vector.extract_strided_slice %103 {offsets = [0, 14], sizes = [2, 1], strides = [1, 1]} : vector<2x25xf32> to vector<2x1xf32>
    %c254_i32 = arith.constant 254 : i32
    %211 = tpu.dynamic_rotate %23 by %c254_i32 dim 1 : vector<2x256xf32>, i32 -> vector<2x256xf32>
    %c14 = arith.constant 14 : index
    %c0_56 = arith.constant 0 : index
    %212 = vector.load %arg12[%c14, %c0_56] : memref<25x256xf32, #tpu.memory_space<vmem>>, vector<1x256xf32>
    %213 = vector.broadcast %212 : vector<1x256xf32> to vector<2x256xf32>
    %214 = arith.mulf %211, %213 : vector<2x256xf32>
    %215 = vector.broadcast %210 : vector<2x1xf32> to vector<2x256xf32>
    %216 = arith.mulf %214, %215 : vector<2x256xf32>
    %217 = arith.addf %201, %216 : vector<2x256xf32>
    %218 = vector.extract_strided_slice %103 {offsets = [0, 15], sizes = [2, 1], strides = [1, 1]} : vector<2x25xf32> to vector<2x1xf32>
    %c242_i32 = arith.constant 242 : i32
    %219 = tpu.dynamic_rotate %23 by %c242_i32 dim 1 : vector<2x256xf32>, i32 -> vector<2x256xf32>
    %c15 = arith.constant 15 : index
    %c0_57 = arith.constant 0 : index
    %220 = vector.load %arg12[%c15, %c0_57] : memref<25x256xf32, #tpu.memory_space<vmem>>, vector<1x256xf32>
    %221 = vector.broadcast %220 : vector<1x256xf32> to vector<2x256xf32>
    %222 = arith.mulf %219, %221 : vector<2x256xf32>
    %223 = vector.broadcast %218 : vector<2x1xf32> to vector<2x256xf32>
    %224 = arith.mulf %222, %223 : vector<2x256xf32>
    %225 = arith.addf %209, %224 : vector<2x256xf32>
    %226 = vector.extract_strided_slice %103 {offsets = [0, 16], sizes = [2, 1], strides = [1, 1]} : vector<2x25xf32> to vector<2x1xf32>
    %c241_i32_58 = arith.constant 241 : i32
    %227 = tpu.dynamic_rotate %23 by %c241_i32_58 dim 1 : vector<2x256xf32>, i32 -> vector<2x256xf32>
    %c16_59 = arith.constant 16 : index
    %c0_60 = arith.constant 0 : index
    %228 = vector.load %arg12[%c16_59, %c0_60] : memref<25x256xf32, #tpu.memory_space<vmem>>, vector<1x256xf32>
    %229 = vector.broadcast %228 : vector<1x256xf32> to vector<2x256xf32>
    %230 = arith.mulf %227, %229 : vector<2x256xf32>
    %231 = vector.broadcast %226 : vector<2x1xf32> to vector<2x256xf32>
    %232 = arith.mulf %230, %231 : vector<2x256xf32>
    %233 = arith.addf %217, %232 : vector<2x256xf32>
    %234 = vector.extract_strided_slice %103 {offsets = [0, 17], sizes = [2, 1], strides = [1, 1]} : vector<2x25xf32> to vector<2x1xf32>
    %c240_i32_61 = arith.constant 240 : i32
    %235 = tpu.dynamic_rotate %23 by %c240_i32_61 dim 1 : vector<2x256xf32>, i32 -> vector<2x256xf32>
    %c17_62 = arith.constant 17 : index
    %c0_63 = arith.constant 0 : index
    %236 = vector.load %arg12[%c17_62, %c0_63] : memref<25x256xf32, #tpu.memory_space<vmem>>, vector<1x256xf32>
    %237 = vector.broadcast %236 : vector<1x256xf32> to vector<2x256xf32>
    %238 = arith.mulf %235, %237 : vector<2x256xf32>
    %239 = vector.broadcast %234 : vector<2x1xf32> to vector<2x256xf32>
    %240 = arith.mulf %238, %239 : vector<2x256xf32>
    %241 = arith.addf %225, %240 : vector<2x256xf32>
    %242 = vector.extract_strided_slice %103 {offsets = [0, 18], sizes = [2, 1], strides = [1, 1]} : vector<2x25xf32> to vector<2x1xf32>
    %c239_i32_64 = arith.constant 239 : i32
    %243 = tpu.dynamic_rotate %23 by %c239_i32_64 dim 1 : vector<2x256xf32>, i32 -> vector<2x256xf32>
    %c18_65 = arith.constant 18 : index
    %c0_66 = arith.constant 0 : index
    %244 = vector.load %arg12[%c18_65, %c0_66] : memref<25x256xf32, #tpu.memory_space<vmem>>, vector<1x256xf32>
    %245 = vector.broadcast %244 : vector<1x256xf32> to vector<2x256xf32>
    %246 = arith.mulf %243, %245 : vector<2x256xf32>
    %247 = vector.broadcast %242 : vector<2x1xf32> to vector<2x256xf32>
    %248 = arith.mulf %246, %247 : vector<2x256xf32>
    %249 = arith.addf %233, %248 : vector<2x256xf32>
    %250 = vector.extract_strided_slice %103 {offsets = [0, 19], sizes = [2, 1], strides = [1, 1]} : vector<2x25xf32> to vector<2x1xf32>
    %c238_i32 = arith.constant 238 : i32
    %251 = tpu.dynamic_rotate %23 by %c238_i32 dim 1 : vector<2x256xf32>, i32 -> vector<2x256xf32>
    %c19 = arith.constant 19 : index
    %c0_67 = arith.constant 0 : index
    %252 = vector.load %arg12[%c19, %c0_67] : memref<25x256xf32, #tpu.memory_space<vmem>>, vector<1x256xf32>
    %253 = vector.broadcast %252 : vector<1x256xf32> to vector<2x256xf32>
    %254 = arith.mulf %251, %253 : vector<2x256xf32>
    %255 = vector.broadcast %250 : vector<2x1xf32> to vector<2x256xf32>
    %256 = arith.mulf %254, %255 : vector<2x256xf32>
    %257 = arith.addf %241, %256 : vector<2x256xf32>
    %258 = vector.extract_strided_slice %103 {offsets = [0, 20], sizes = [2, 1], strides = [1, 1]} : vector<2x25xf32> to vector<2x1xf32>
    %c226_i32 = arith.constant 226 : i32
    %259 = tpu.dynamic_rotate %23 by %c226_i32 dim 1 : vector<2x256xf32>, i32 -> vector<2x256xf32>
    %c20 = arith.constant 20 : index
    %c0_68 = arith.constant 0 : index
    %260 = vector.load %arg12[%c20, %c0_68] : memref<25x256xf32, #tpu.memory_space<vmem>>, vector<1x256xf32>
    %261 = vector.broadcast %260 : vector<1x256xf32> to vector<2x256xf32>
    %262 = arith.mulf %259, %261 : vector<2x256xf32>
    %263 = vector.broadcast %258 : vector<2x1xf32> to vector<2x256xf32>
    %264 = arith.mulf %262, %263 : vector<2x256xf32>
    %265 = arith.addf %249, %264 : vector<2x256xf32>
    %266 = vector.extract_strided_slice %103 {offsets = [0, 21], sizes = [2, 1], strides = [1, 1]} : vector<2x25xf32> to vector<2x1xf32>
    %c225_i32 = arith.constant 225 : i32
    %267 = tpu.dynamic_rotate %23 by %c225_i32 dim 1 : vector<2x256xf32>, i32 -> vector<2x256xf32>
    %c21 = arith.constant 21 : index
    %c0_69 = arith.constant 0 : index
    %268 = vector.load %arg12[%c21, %c0_69] : memref<25x256xf32, #tpu.memory_space<vmem>>, vector<1x256xf32>
    %269 = vector.broadcast %268 : vector<1x256xf32> to vector<2x256xf32>
    %270 = arith.mulf %267, %269 : vector<2x256xf32>
    %271 = vector.broadcast %266 : vector<2x1xf32> to vector<2x256xf32>
    %272 = arith.mulf %270, %271 : vector<2x256xf32>
    %273 = arith.addf %257, %272 : vector<2x256xf32>
    %274 = vector.extract_strided_slice %103 {offsets = [0, 22], sizes = [2, 1], strides = [1, 1]} : vector<2x25xf32> to vector<2x1xf32>
    %c224_i32 = arith.constant 224 : i32
    %275 = tpu.dynamic_rotate %23 by %c224_i32 dim 1 : vector<2x256xf32>, i32 -> vector<2x256xf32>
    %c22 = arith.constant 22 : index
    %c0_70 = arith.constant 0 : index
    %276 = vector.load %arg12[%c22, %c0_70] : memref<25x256xf32, #tpu.memory_space<vmem>>, vector<1x256xf32>
    %277 = vector.broadcast %276 : vector<1x256xf32> to vector<2x256xf32>
    %278 = arith.mulf %275, %277 : vector<2x256xf32>
    %279 = vector.broadcast %274 : vector<2x1xf32> to vector<2x256xf32>
    %280 = arith.mulf %278, %279 : vector<2x256xf32>
    %281 = arith.addf %265, %280 : vector<2x256xf32>
    %282 = vector.extract_strided_slice %103 {offsets = [0, 23], sizes = [2, 1], strides = [1, 1]} : vector<2x25xf32> to vector<2x1xf32>
    %c223_i32 = arith.constant 223 : i32
    %283 = tpu.dynamic_rotate %23 by %c223_i32 dim 1 : vector<2x256xf32>, i32 -> vector<2x256xf32>
    %c23 = arith.constant 23 : index
    %c0_71 = arith.constant 0 : index
    %284 = vector.load %arg12[%c23, %c0_71] : memref<25x256xf32, #tpu.memory_space<vmem>>, vector<1x256xf32>
    %285 = vector.broadcast %284 : vector<1x256xf32> to vector<2x256xf32>
    %286 = arith.mulf %283, %285 : vector<2x256xf32>
    %287 = vector.broadcast %282 : vector<2x1xf32> to vector<2x256xf32>
    %288 = arith.mulf %286, %287 : vector<2x256xf32>
    %289 = arith.addf %273, %288 : vector<2x256xf32>
    %290 = vector.extract_strided_slice %103 {offsets = [0, 24], sizes = [2, 1], strides = [1, 1]} : vector<2x25xf32> to vector<2x1xf32>
    %c222_i32 = arith.constant 222 : i32
    %291 = tpu.dynamic_rotate %23 by %c222_i32 dim 1 : vector<2x256xf32>, i32 -> vector<2x256xf32>
    %c24 = arith.constant 24 : index
    %c0_72 = arith.constant 0 : index
    %292 = vector.load %arg12[%c24, %c0_72] : memref<25x256xf32, #tpu.memory_space<vmem>>, vector<1x256xf32>
    %293 = vector.broadcast %292 : vector<1x256xf32> to vector<2x256xf32>
    %294 = arith.mulf %291, %293 : vector<2x256xf32>
    %295 = vector.broadcast %290 : vector<2x1xf32> to vector<2x256xf32>
    %296 = arith.mulf %294, %295 : vector<2x256xf32>
    %297 = arith.addf %281, %296 : vector<2x256xf32>
    %298 = arith.addf %297, %289 : vector<2x256xf32>
    %c0_73 = arith.constant 0 : index
    %c0_74 = arith.constant 0 : index
    %299 = vector.load %arg9[%c0_73, %c0_74] : memref<2x1xf32, #tpu.memory_space<vmem>>, vector<2x1xf32>
    %300 = vector.broadcast %299 : vector<2x1xf32> to vector<2x256xf32>
    %301 = arith.addf %298, %300 : vector<2x256xf32>
    %302 = arith.negf %301 : vector<2x256xf32>
    %303 = math.exp %302 : vector<2x256xf32>
    %cst_75 = arith.constant 1.000000e+00 : f32
    %304 = vector.broadcast %cst_75 : f32 to vector<2x256xf32>
    %305 = arith.addf %304, %303 : vector<2x256xf32>
    %306 = arith.divf %304, %305 : vector<2x256xf32>
    %307 = arith.mulf %301, %306 : vector<2x256xf32>
    %c4_76 = arith.constant 4 : index
    %c0_77 = arith.constant 0 : index
    %308 = vector.load %arg14[%c4_76, %c0_77] : memref<8x256xf32, #tpu.memory_space<vmem>>, vector<2x256xf32>
    tpu.vector_store %arg14[%c4_76, %c0_77], %102 {strides = array<i32>} : memref<8x256xf32, #tpu.memory_space<vmem>>, vector<2x256xf32>,
    %c6_78 = arith.constant 6 : index
    %c0_79 = arith.constant 0 : index
    %309 = vector.load %arg14[%c6_78, %c0_79] : memref<8x256xf32, #tpu.memory_space<vmem>>, vector<2x256xf32>
    tpu.vector_store %arg14[%c6_78, %c0_79], %307 {strides = array<i32>} : memref<8x256xf32, #tpu.memory_space<vmem>>, vector<2x256xf32>,
    %c0_80 = arith.constant 0 : index
    %c0_81 = arith.constant 0 : index
    %310 = vector.load %arg10[%c0_80, %c0_81] : memref<8x8xf32, #tpu.memory_space<vmem>>, vector<8x8xf32>
    %c0_82 = arith.constant 0 : index
    %c0_83 = arith.constant 0 : index
    %311 = vector.load %arg14[%c0_82, %c0_83] : memref<8x256xf32, #tpu.memory_space<vmem>>, vector<8x256xf32>
    %cst_84 = arith.constant dense<0.000000e+00> : vector<8x256xf32>
    %312 = tpu.matmul %310, %311, %cst_84 {dimension_numbers = #tpu.dot_dimension_numbers<[1], [0], [0], [1], [0, 0, 1, 1], [], []>} : vector<8x8xf32>, vector<8x256xf32>, vector<8x256xf32> -> vector<8x256xf32>
    %c0_85 = arith.constant 0 : index
    %c0_86 = arith.constant 0 : index
    %313 = vector.load %arg11[%c0_85, %c0_86] : memref<8x1xf32, #tpu.memory_space<vmem>>, vector<8x1xf32>
    %314 = vector.broadcast %313 : vector<8x1xf32> to vector<8x256xf32>
    %315 = arith.addf %312, %314 : vector<8x256xf32>
    %316 = arith.negf %315 : vector<8x256xf32>
    %317 = math.exp %316 : vector<8x256xf32>
    %cst_87 = arith.constant 1.000000e+00 : f32
    %318 = vector.broadcast %cst_87 : f32 to vector<8x256xf32>
    %319 = arith.addf %318, %317 : vector<8x256xf32>
    %320 = arith.divf %318, %319 : vector<8x256xf32>
    %321 = arith.mulf %315, %320 : vector<8x256xf32>
    %c0_88 = arith.constant 0 : index
    %c0_89 = arith.constant 0 : index
    %c0_90 = arith.constant 0 : index
    %322 = vector.load %arg13[%c0_88, %c0_89, %c0_90] : memref<1x8x256xf32, #tpu.memory_space<vmem>>, vector<1x8x256xf32>
    %323 = vector.shape_cast %322 : vector<1x8x256xf32> to vector<8x256xf32>
    %324 = vector.shape_cast %321 : vector<8x256xf32> to vector<1x8x256xf32>
    tpu.vector_store %arg13[%c0_88, %c0_89, %c0_90], %324 {strides = array<i32>} : memref<1x8x256xf32, #tpu.memory_space<vmem>>, vector<1x8x256xf32>,
    return
  }
  func.func @transform_0(%arg0: i32) -> (i32, i32, i32) {
    %c0_i32 = arith.constant 0 : i32
    %c0_i32_0 = arith.constant 0 : i32
    %c0_i32_1 = arith.constant 0 : i32
    return %arg0, %c0_i32, %c0_i32_0 : i32, i32, i32
  }
  func.func @transform_1(%arg0: i32) -> (i32, i32) {
    %c0_i32 = arith.constant 0 : i32
    %c0_i32_0 = arith.constant 0 : i32
    %c0_i32_1 = arith.constant 0 : i32
    return %c0_i32, %c0_i32_0 : i32, i32
  }
  func.func @transform_2(%arg0: i32) -> (i32, i32) {
    %c0_i32 = arith.constant 0 : i32
    %c0_i32_0 = arith.constant 0 : i32
    %c0_i32_1 = arith.constant 0 : i32
    return %c0_i32, %c0_i32_0 : i32, i32
  }
  func.func @transform_3(%arg0: i32) -> (i32, i32) {
    %c0_i32 = arith.constant 0 : i32
    %c0_i32_0 = arith.constant 0 : i32
    %c0_i32_1 = arith.constant 0 : i32
    return %c0_i32, %c0_i32_0 : i32, i32
  }
  func.func @transform_4(%arg0: i32) -> (i32, i32) {
    %c0_i32 = arith.constant 0 : i32
    %c0_i32_0 = arith.constant 0 : i32
    %c0_i32_1 = arith.constant 0 : i32
    return %c0_i32, %c0_i32_0 : i32, i32
  }
  func.func @transform_5(%arg0: i32) -> (i32, i32) {
    %c0_i32 = arith.constant 0 : i32
    %c0_i32_0 = arith.constant 0 : i32
    %c0_i32_1 = arith.constant 0 : i32
    return %c0_i32, %c0_i32_0 : i32, i32
  }
  func.func @transform_6(%arg0: i32) -> (i32, i32) {
    %c0_i32 = arith.constant 0 : i32
    %c0_i32_0 = arith.constant 0 : i32
    %c0_i32_1 = arith.constant 0 : i32
    return %c0_i32, %c0_i32_0 : i32, i32
  }
  func.func @transform_7(%arg0: i32) -> (i32, i32) {
    %c0_i32 = arith.constant 0 : i32
    %c0_i32_0 = arith.constant 0 : i32
    %c0_i32_1 = arith.constant 0 : i32
    return %c0_i32, %c0_i32_0 : i32, i32
  }
  func.func @transform_8(%arg0: i32) -> (i32, i32) {
    %c0_i32 = arith.constant 0 : i32
    %c0_i32_0 = arith.constant 0 : i32
    %c0_i32_1 = arith.constant 0 : i32
    return %c0_i32, %c0_i32_0 : i32, i32
  }
  func.func @transform_9(%arg0: i32) -> (i32, i32) {
    %c0_i32 = arith.constant 0 : i32
    %c0_i32_0 = arith.constant 0 : i32
    %c0_i32_1 = arith.constant 0 : i32
    return %c0_i32, %c0_i32_0 : i32, i32
  }
  func.func @transform_10(%arg0: i32) -> (i32, i32) {
    %c0_i32 = arith.constant 0 : i32
    %c0_i32_0 = arith.constant 0 : i32
    %c0_i32_1 = arith.constant 0 : i32
    return %c0_i32, %c0_i32_0 : i32, i32
  }
  func.func @transform_11(%arg0: i32) -> (i32, i32) {
    %c0_i32 = arith.constant 0 : i32
    %c0_i32_0 = arith.constant 0 : i32
    %c0_i32_1 = arith.constant 0 : i32
    return %c0_i32, %c0_i32_0 : i32, i32
  }
  func.func @transform_12(%arg0: i32) -> (i32, i32, i32) {
    %c0_i32 = arith.constant 0 : i32
    %c0_i32_0 = arith.constant 0 : i32
    %c0_i32_1 = arith.constant 0 : i32
    return %arg0, %c0_i32, %c0_i32_0 : i32, i32, i32
  }
}

</mosaic_0001>

<bundles_post_ra>
// kernel: tpu_custom_call.1
= control target key start
LH: loop header
LB: loop body
LE: loop exit
PB: predicated region body
PF: predicated region fallthrough
CT: control target
= control target key end

     0   :  { %s3288_s0 = inlined_call_operand.vmem [shape: f32[2,4,256], index: 0, kind: input, shape index: {}]   ;;  %s3289_s1 = inlined_call_operand.hbm [shape: f32[2,4], index: 1, kind: input, shape index: {}]   ;;  %s3290_s2 = inlined_call_operand.hbm [shape: f32[2,4], index: 2, kind: input, shape index: {}]   ;;  %s3291_s3 = inlined_call_operand.vmem [shape: f32[2,1], index: 3, kind: input, shape index: {}]   ;;  %s3292_s4 = inlined_call_operand.vmem [shape: f32[2,1], index: 4, kind: input, shape index: {}]   ;;  %s3293_s5 = inlined_call_operand.vmem [shape: f32[2,9], index: 5, kind: input, shape index: {}]   ;;  %s3294_s6 = inlined_call_operand.vmem [shape: f32[2,1], index: 6, kind: input, shape index: {}]   ;;  %s3295_s7 = inlined_call_operand.vmem [shape: f32[2,25], index: 7, kind: input, shape index: {}]   ;;  %s3296_s8 = inlined_call_operand.vmem [shape: f32[2,1], index: 8, kind: input, shape index: {}]   ;;  %s3297_s9 = inlined_call_operand.vmem [shape: f32[8,8], index: 9, kind: input, shape index: {}]   ;;  %s3298_s10 = inlined_call_operand.vmem [shape: f32[8,1], index: 10, kind: input, shape index: {}]   ;;  %s3299_s11 = inlined_call_operand.hbm [shape: f32[25,256], index: 11, kind: input, shape index: {}]   ;;  %s3300_s12 = inlined_call_operand.hbm [shape: f32[2,8,256], index: 12, kind: output, shape index: {}]  }
   0x1   :  { %3375 = sst [smem:[#allocation65_spill]] %s3288_s0 }
   0x2   :  { %3376 = sst [smem:[#allocation66_spill]] %s3289_s1 }
   0x3   :  { %17 = vsyncpa [#allocation4], 0 }
   0x4   :  { %18 = vsyncpa [#allocation7], 0 }
   0x5   :  { %19 = vsyncpa [#allocation5], 0 }
   0x6   :  { %21 = vsyncpa [#allocation5 + $0x1], 0  ;;  %s2295_s21 = smov 0   ;;  %s2297_s22 = smov 0  }
   0x7   :  { %s2299_s23 = smov 0   ;;  %s2301_s24 = smov 0  }
   0x8 LB: > { %s2316_s25 = sadd.s32 4294967295, %s2172_s24   ;;  %s1791_s26 = sadd.s32 4294967294, %s2172_s24   ;;  %s2172_s24 = sphi %s2301_s24, %s3525_s24   ;;  %s2168_s23 = sphi %s2299_s23, %s3524_s23   ;;  %s2164_s22 = sphi %s2297_s22, %s3523_s22   ;;  %s2160_s21 = sphi %s2295_s21, %s3522_s21  }
   0x9   : > { %s2320_s27 = sadd.s32 1, %s2172_s24   ;;  %s291_s28 = sadd.s32 1, %s2168_s23 }
   0xa   : > { %s288_s29 = ssub.s32 %s2172_s24, %s2320_s27  ;;  %p301_p0 = scmp.ne.s32.totalorder %s2168_s23, %s2164_s22 }
   0xb   : > { %p289_p1 = scmp.eq.s32.totalorder %s288_s29, 0  ;;  %p302_p2 = scmp.eq.s32.totalorder %s2316_s25, 1 }
   0xc   : > { %p307_p3 = scmp.ne.s32.totalorder %s2164_s22, %s2160_s21  ;;  %p308_p4 = scmp.eq.s32.totalorder %s1791_s26, 1 }
   0xd   : > { %s2331_s30 = scalar_select %p289_p1, %s2168_s23, %s291_s28  }
   0xe   : > { %p2333_p5 = por %p302_p2, %p301_p0  ;;  %p2337_p6 = por %p308_p4, %p307_p3 }
   0xf   : > { %3377 = sst [smem:[#allocation13_spill]] %s2331_s30  ;;  %p1792_p7 = scmp.ge.s32.totalorder %s2172_s24, 1 }
  0x10   : > { %s3378_s13 = scalar_select %p2333_p5, 1, 0 }
  0x11   : > { %s3379_s14 = scalar_select %p2337_p6, 1, 0 }
  0x12   : > { %p315_p8 = scmp.lt.s32.totalorder %s2172_s24, 3  ;;  %p3301_p9 = scmp.eq.s32.totalorder %s2316_s25, 0 }
  0x13   : > { %s2174_s16 = smov [#allocation6]   ;;  %s2175_s18 = smov [#allocation3]  }
  0x14   : > { %p2344_p10 = pnand %p1792_p7, %p315_p8  ;;  %s339_s17 = sshll.u32 %s2174_s16, 4  ;;  %s340_s17 = int_to_ptr.vmem [resolvable:$true] %s339_s17 }
  0x15   : > { %s328_s19 = sshll.u32 %s2175_s18, 4  ;;  %s2176_s26 = smov [#allocation8]   ;;  %s329_s19 = int_to_ptr.vmem [resolvable:$true] %s328_s19 }
  0x16   : > { %s3380_s15 = scalar_select %p2344_p10, 1, 0 }
  0x17   : > { %p1842_p11 = pneg %p2344_p10  ;;  %s373_s28 = sshll.u32 %s2176_s26, 4  ;;  %s2356_s28 = int_to_ptr.vmem [resolvable:$true] %s373_s28 }
  0x18   : > { %s2037_s29 = scalar_lea.vmem %s340_s17, 32  ;;  %p2045_p3 = scmp.lt.s32.totalorder %s340_s17, %s340_s17 }
  0x19   : > { %p2352_p12 = pnand %p3301_p9, %p1842_p11  ;;  %p2038_p0 = scmp.ne.s32.totalorder %s340_s17, %s2037_s29 }
  0x1a   : > { %p2046_p4 = scmp.lt.s32.totalorder %s2037_s29, %s2037_s29 }
  0x1b   : > { %p2028_p13 = pneg %p2352_p12 }
  0x1c   : > { %p2047_p7 = por %p2046_p4, %p2045_p3 }
  0x1d   : > { %p2040_p1 = pnand %p2038_p0, %p2028_p13 }
  0x1f   : > { %p2041_p2 = pneg %p2040_p1 }
  0x21   : > { %p2048_p8 = pnand %p2047_p7, %p2041_p2 }
  0x23   : > { %2051 = shalt.err (!%p2048_p8)
}
  0x24   : > { %1848 = dma.hbm_to_vmem [thread:$0]  (!%p2352_p12), %s3290_s2, 32, %s340_s17, [#allocation7]  }
  0x25   : > { %s2063_s26 = scalar_lea.vmem %s329_s19, 32  ;;  %p2071_p0 = scmp.lt.s32.totalorder %s329_s19, %s329_s19 }
  0x26   : > { %p2064_p11 = scmp.ne.s32.totalorder %s329_s19, %s2063_s26  ;;  %p2072_p1 = scmp.lt.s32.totalorder %s2063_s26, %s2063_s26 }
  0x28   : > { %p2066_p9 = pnand %p2064_p11, %p2028_p13  ;;  %p2073_p5 = por %p2072_p1, %p2071_p0 }
  0x2a   : > { %p2067_p6 = pneg %p2066_p9 }
  0x2c   : > { %p2074_p10 = pnand %p2073_p5, %p2067_p6 }
  0x2e   : > { %2077 = shalt.err (!%p2074_p10)
}
  0x2f   : > { %s3382_s1 = sld [smem:[#allocation66_spill]]  ;;  %s2089_s17 = scalar_lea.vmem %s2356_s28, 1024 }
  0x30   : > { %p2090_p2 = scmp.ne.s32.totalorder %s2356_s28, %s2089_s17  ;;  %p2097_p4 = scmp.lt.s32.totalorder %s2356_s28, %s2356_s28 }
  0x31   : > { %p2098_p5 = scmp.lt.s32.totalorder %s2089_s17, %s2089_s17 }
  0x32   : > { %p2092_p9 = pnand %p2090_p2, %p2028_p13 }
  0x33   : > { %p2099_p6 = por %p2098_p5, %p2097_p4 }
  0x34   : > { %p2093_p3 = pneg %p2092_p9 }
  0x35   : > { %1845 = dma.hbm_to_vmem [thread:$0]  (!%p2352_p12), %s3382_s1, 32, %s329_s19, [#allocation4]  }
  0x36   : > { %p2100_p10 = pnand %p2099_p6, %p2093_p3 }
  0x38   : > { %2103 = shalt.err (!%p2100_p10)
}
  0x39   : > { %s2177_s16 = smov 256   ;;  %s2178_s30 = smov 16  }
  0x3a   : > { %1851 = dma.hbm_to_vmem [thread:$0]  (!%p2352_p12), %s3299_s11, 1024, %s2356_s28, [#allocation7], %s2177_s16, %s2177_s16, %s2178_s30  }
  0x3b   : > { %p3383_p7 = scmp.ne.s32.totalorder %s3380_s15, 0 }
  0x3d   : > { %397 = sbr.rel (%p3383_p7) target bundleno = 892 (0x37c), region = 68 }
  0x42   : > { %p3384_p13 = scmp.eq.s32.totalorder %s2316_s25, 0 }
  0x44   : > { %2147 = dma.done.wait (%p3384_p13), [#allocation4], 32   ;;  %p3385_p8 = pmov %p3384_p13 }
  0x46   : > { %2149 = vsyncadd (%p3385_p8), [#allocation4], 4294967264  ;;  %p3386_p11 = pmov %p3385_p8 }
  0x47   : > { %p3387_p0 = pmov %p3385_p8 }
  0x48   : > { %2151 = dma.done.wait (%p3386_p11), [#allocation7], 1056  }
  0x49   : > { %2153 = vsyncadd (%p3387_p0), [#allocation7], 4294966240  ;;  %p447_p1 = scmp.lt.s32.totalorder %s2316_s25, 1  ;;  %v2179_v0 = vmov 0.0   ;;  %v2180_v1 = vmov 0   ;;  %s3388_s0 = sld [smem:[#allocation65_spill]] }
  0x4a   : > { %535 = vmatprep.mubr.f32.mxu0 %v2179_v0  ;;  %630 = vmatprep.mubr.f32.mxu1 %v2179_v0  ;;  %vm466_vm0 = vcmask 1043456   ;;  %v2409_v4 = vld [vmem:[%s3295_s7] sm:$0x3]  ;;  %v453_v6 = vld [vmem:[#allocation3] sm:$0x3]  ;;  %vm462_vm1 = vcmask 31744  }
  0x4b   : > { %s448_s15 = scalar_select %p447_p1, %s2316_s25, 1  ;;  %1951 = vset.pattern.permute.xlu1 %v2180_v1  ;;  %1950 = vset.pattern.permute.xlu0 %v2180_v1  ;;  %v557_v5 = vld [vmem:[%s3292_s4] sm:$0x3]  ;;  %v556_v7 = vld [vmem:[#allocation6] sm:$0x3]  ;;  %v2181_v9 = vmov 2  }
  0x4c   : > { %957 = vperm.xlu1 %1951, %v2409_v4   ;;  %560 = vperm.xlu0 %1950, %v557_v5   ;;  %v454_v8 = vld [vmem:[%s3291_s3] sm:$0x3]  ;;  %v2182_v10 = vmov 1   ;;  %v2183_v11 = vmov 4   ;;  %v2184_v12 = vmov 6   ;;  %v2185_v13 = vmov 5  }
  0x4d   : > { %s1826_s19 = sshll.u32 %s448_s15, 3  ;;  %v2186_v14 = vmov 10   ;;  %v2187_v15 = vmov 8   ;;  %v2188_v16 = vmov 11   ;;  %v2189_v17 = vmov 9   ;;  %s3305_s28 = smov 32  }
  0x4e   : > { %v2190_v18 = vmov 14   ;;  %v2191_v19 = vmov 12   ;;  %v2192_v20 = vmov 15   ;;  %v2193_v21 = vmov 13   ;;  %v661_v22 = vld [vmem:[%s3293_s5] sm:$0x3] }
  0x4f   : > { %s451_s29 = scalar_lea.vmem %s3388_s0, %s1826_s19  ;;  %v2194_v23 = vmov 16   ;;  %v2195_v24 = vmov 17   ;;  %v2196_v25 = vmov 3   ;;  %v2197_v26 = vmov 18   ;;  %s2207_s17 = smov 33  }
  0x50   : > { %v452_v2 = vld [vmem:[%s451_s29] sm:$0xff]  ;;  %1952 = vset.pattern.permute.xlu1 %v2181_v9  ;;  %457 = vperm.xlu0 %1950, %v454_v8   ;;  %v2198_v27 = vmov 20   ;;  %v2199_v28 = vmov 19   ;;  %v2200_v29 = vmov 22   ;;  %v2201_v30 = vmov 21   ;;  %s3308_s29 = smov 34  }
  0x51   : > { %v461_v3 = vcombine.high %v452_v2, %v452_v2  ;;  %1013 = vperm.xlu1 %1952, %v2409_v4   ;;  %v2202_v31 = vmov 7   ;;  %v2203_v32 = vmov 23   ;;  %v2204_v33 = vmov 24   ;;  %s2208_s16 = smov 17   ;;  %s2209_s30 = smov 31  }
  0x52   : > { %s3304_s18 = smov 2   ;;  %s2211_s26 = smov 30  }
  0x53   : > { %1804 = vmatprep.subr.msk.mxu0 %vm466_vm0, %v461_v3  ;;  %1809 = vmatprep.subr.msk.mxu1 %vm466_vm0, %v461_v3  ;;  %s3306_s15 = smov 126   ;;  %s3307_s19 = smov 18  }
  0x54   : > { %1805 = vmatpush1.msk.msra.mxu0 %vm466_vm0, %v452_v2  ;;  %1810 = vmatpush1.msk.msra.mxu1 %vm466_vm0, %v452_v2  ;;  %s3313_s20 = smov 113   ;;  %p3519_p2 = scmp.ne.s32.totalorder %s3378_s13, 0 }
  0x55   : > { %1806 = vmatmul.mubr.msk.f32.vlgmr.msra.gmra.mxu0 %vm462_vm1, %v453_v6  ;;  %1811 = vmatmul.mubr.msk.f32.vlgmr.msra.gmra.mxu1 %vm462_vm1, %v556_v7  ;;  %s2229_s0 = smov [#allocation9]  }
  0x56   : > { %1663 = vmatprep.mubr.f32.mxu0 %v2179_v0  ;;  %1953 = vset.pattern.permute.xlu0 %v2182_v10 }
  0x57   : > { %1954 = vset.pattern.permute.xlu1 %v2183_v11  ;;  %985 = vperm.xlu0 %1953, %v2409_v4  }
  0x58   : > { %1073 = vperm.xlu1 %1954, %v2409_v4  }
  0x5b   : > { %1956 = vset.pattern.permute.xlu0 %v2184_v12 }
  0x5c   : > { %1955 = vset.pattern.permute.xlu1 %v2185_v13  ;;  %1119 = vperm.xlu0 %1956, %v2409_v4  }
  0x5d   : > { %1103 = vperm.xlu1 %1955, %v2409_v4  }
  0x60   : > { %1959 = vset.pattern.permute.xlu0 %v2186_v14 }
  0x61   : > { %1957 = vset.pattern.permute.xlu1 %v2187_v15  ;;  %1211 = vperm.xlu0 %1959, %v2409_v4  }
  0x62   : > { %1151 = vperm.xlu1 %1957, %v2409_v4  }
  0x65   : > { %1960 = vset.pattern.permute.xlu0 %v2188_v16 }
  0x66   : > { %1958 = vset.pattern.permute.xlu1 %v2189_v17  ;;  %1227 = vperm.xlu0 %1960, %v2409_v4  }
  0x67   : > { %1181 = vperm.xlu1 %1958, %v2409_v4  }
  0x6a   : > { %1963 = vset.pattern.permute.xlu0 %v2190_v18 }
  0x6b   : > { %1961 = vset.pattern.permute.xlu1 %v2191_v19  ;;  %1281 = vperm.xlu0 %1963, %v2409_v4  }
  0x6c   : > { %1235 = vperm.xlu1 %1961, %v2409_v4  }
  0x6f   : > { %1964 = vset.pattern.permute.xlu0 %v2192_v20 }
  0x70   : > { %1962 = vset.pattern.permute.xlu1 %v2193_v21  ;;  %1311 = vperm.xlu0 %1964, %v2409_v4  }
  0x71   : > { %1251 = vperm.xlu1 %1962, %v2409_v4  }
  0x74   : > { %1967 = vset.pattern.permute.xlu0 %v2181_v9 }
  0x75   : > { %1965 = vset.pattern.permute.xlu1 %v2194_v23  ;;  %744 = vperm.xlu0 %1967, %v661_v22  }
  0x76   : > { %1327 = vperm.xlu1 %1965, %v2409_v4  }
  0x79   : > { %1968 = vset.pattern.permute.xlu0 %v2195_v24 }
  0x7a   : > { %1966 = vset.pattern.permute.xlu1 %v2180_v1  ;;  %1343 = vperm.xlu0 %1968, %v2409_v4  }
  0x7b   : > { %688 = vperm.xlu1 %1966, %v661_v22  }
  0x7e   : > { %1969 = vset.pattern.permute.xlu0 %v2196_v25 }
  0x7f   : > { %1970 = vset.pattern.permute.xlu1 %v2197_v26  ;;  %1043 = vperm.xlu0 %1969, %v2409_v4  }
  0x80   : > { %1359 = vperm.xlu1 %1970, %v2409_v4  }
  0x83   : > { %774 = vperm.xlu0 %1969, %v661_v22  }
  0x84   : > { %1971 = vset.pattern.permute.xlu1 %v2182_v10 }
  0x85   : > { %716 = vperm.xlu1 %1971, %v661_v22  }
  0x87   : > { %1974 = vset.pattern.permute.xlu0 %v2198_v27 }
  0x88   : > { %1419 = vperm.xlu0 %1974, %v2409_v4  }
  0x89   : > { %1972 = vset.pattern.permute.xlu1 %v2183_v11 }
  0x8a   : > { %782 = vperm.xlu1 %1972, %v661_v22  }
  0x8c   : > { %1975 = vset.pattern.permute.xlu0 %v2185_v13 }
  0x8d   : > { %812 = vperm.xlu0 %1975, %v661_v22  }
  0x8e   : > { %1973 = vset.pattern.permute.xlu1 %v2199_v28 }
  0x8f   : > { %1389 = vperm.xlu1 %1973, %v2409_v4  }
  0x91   : > { %1978 = vset.pattern.permute.xlu0 %v2200_v29 }
  0x92   : > { %1479 = vperm.xlu0 %1978, %v2409_v4  }
  0x93   : > { %1976 = vset.pattern.permute.xlu1 %v2184_v12 }
  0x94   : > { %842 = vperm.xlu1 %1976, %v661_v22  }
  0x96   : > { %1979 = vset.pattern.permute.xlu0 %v2202_v31 }
  0x97   : > { %1135 = vperm.xlu0 %1979, %v2409_v4  }
  0x98   : > { %1977 = vset.pattern.permute.xlu1 %v2201_v30  ;;  %v911_v30 = vld [vmem:[%s3294_s6] sm:$0x3] }
  0x99   : > { %1449 = vperm.xlu1 %1977, %v2409_v4  }
  0x9b   : > { %872 = vperm.xlu0 %1979, %v661_v22  }
  0x9d   : > { %1980 = vset.pattern.permute.xlu1 %v2187_v15 }
  0x9e   : > { %902 = vperm.xlu1 %1980, %v661_v22  }
  0x9f   : > { %1982 = vset.pattern.permute.xlu0 %v2204_v33 }
  0xa0   : > { %1539 = vperm.xlu0 %1982, %v2409_v4  }
  0xa2   : > { %1981 = vset.pattern.permute.xlu1 %v2203_v32 }
  0xa3   : > { %1509 = vperm.xlu1 %1981, %v2409_v4  }
  0xa4   : > { %1983 = vset.pattern.permute.xlu0 %v2180_v1 }
  0xa7   : > { %1984 = vset.pattern.permute.xlu1 %v2180_v1 }
  0xc7   : > { %v561_v34 = vpop.permute.xlu0 %560  ;;  %v2468_v2 = vpop.permute.xlu1 %957 }
  0xcb   : > { %v458_v35 = vpop.permute.xlu0 %457 }
  0xcc   : > { %v2478_v3 = vpop.permute.xlu1 %1013 }
  0xd2   : > { %v2484_v4 = vpop.permute.xlu0 %985 }
  0xd3   : > { %v2486_v5 = vpop.permute.xlu1 %1073 }
  0xd7   : > { %v2496_v6 = vpop.permute.xlu0 %1119 }
  0xd8   : > { %v2498_v7 = vpop.permute.xlu1 %1103 }
  0xdc   : > { %v2504_v8 = vpop.permute.xlu0 %1211 }
  0xdd   : > { %3391 = vst [vmem:[#allocation16_spill] sm:$0xff] %v2504_v8  ;;  %v2506_v9 = vpop.permute.xlu1 %1151  ;;  %v797_v8 = vld [vmem:[#allocation8 + $0x15] ss:$8 sm:$0x3] }
  0xe1   : > { %v2516_v10 = vpop.permute.xlu0 %1227 }
  0xe2   : > { %v2518_v11 = vpop.permute.xlu1 %1181 }
  0xe6   : > { %v2524_v12 = vpop.permute.xlu0 %1281 }
  0xe7   : > { %3392 = vst [vmem:[#allocation17_spill] sm:$0xff] %v2524_v12  ;;  %v2526_v13 = vpop.permute.xlu1 %1235  ;;  %v2799_v12 = vld [vmem:[#allocation8 + $0x26] ss:$8 sm:$0x3] }
  0xe8   : > { %3449 = vst [vmem:[#allocation60_spill] sm:$0xff] %v2799_v12 }
  0xeb   : > { %v2536_v14 = vpop.permute.xlu0 %1311 }
  0xec   : > { %3393 = vst [vmem:[#allocation18_spill] sm:$0xff] %v2536_v14  ;;  %v2538_v15 = vpop.permute.xlu1 %1251  ;;  %v941_v14 = vld [vmem:[#allocation8] ss:$8 sm:$0x3] }
  0xed   : > { %3394 = vst [vmem:[#allocation19_spill] sm:$0xff] %v2538_v15 }
  0xf0   : > { %v2544_v16 = vpop.permute.xlu0 %744 }
  0xf1   : > { %3396 = vst [vmem:[#allocation20_spill] sm:$0xff] %v2544_v16  ;;  %v2546_v17 = vpop.permute.xlu1 %1327  ;;  %v887_v16 = vld [vmem:[#allocation8 + $0x22] ss:$8 sm:$0x3] }
  0xf2   : > { %3397 = vst [vmem:[#allocation21_spill] sm:$0xff] %v2546_v17 }
  0xf5   : > { %v2555_v18 = vpop.permute.xlu0 %1343 }
  0xf6   : > { %3399 = vst [vmem:[#allocation22_spill] sm:$0xff] %v2555_v18  ;;  %v2557_v19 = vpop.permute.xlu1 %688 }
  0xf7   : > { %3400 = vst [vmem:[#allocation23_spill] sm:$0xff] %v2557_v19  ;;  %v2881_v19 = vld [vmem:[#allocation8 + $0x16] ss:$8 sm:$0x3] }
  0xfa   : > { %v2562_v20 = vpop.permute.xlu0 %1043 }
  0xfb   : > { %v2564_v21 = vpop.permute.xlu1 %1359 }
  0xfc   : > { %3401 = vst [vmem:[#allocation24_spill] sm:$0xff] %v2564_v21 }
  0xfe   : > { %v2573_v22 = vpop.permute.xlu0 %774 }
  0xff   : > { %3402 = vst [vmem:[#allocation25_spill] sm:$0xff] %v2573_v22 }
 0x100   : > { %v2575_v23 = vpop.permute.xlu1 %716 }
 0x101   : > { %3403 = vst [vmem:[#allocation26_spill] sm:$0xff] %v2575_v23 }
 0x103   : > { %v2579_v24 = vpop.permute.xlu0 %1419 }
 0x104   : > { %3404 = vst [vmem:[#allocation27_spill] sm:$0xff] %v2579_v24  ;;  %v857_v24 = vld [vmem:[#allocation8 + $0x21] ss:$8 sm:$0x3] }
 0x105   : > { %v2581_v25 = vpop.permute.xlu1 %782 }
 0x106   : > { %3405 = vst [vmem:[#allocation28_spill] sm:$0xff] %v2581_v25 }
 0x108   : > { %v2591_v27 = vpop.permute.xlu0 %812 }
 0x109   : > { %3408 = vst [vmem:[#allocation30_spill] sm:$0xff] %v2591_v27  ;;  %v1548_v27 = vld [vmem:[%s3296_s8] sm:$0x3] }
 0x10a   : > { %v2589_v26 = vpop.permute.xlu1 %1389 }
 0x10b   : > { %3407 = vst [vmem:[#allocation29_spill] sm:$0xff] %v2589_v26  ;;  %v1088_v26 = vld [vmem:[#allocation8 + $0x5] ss:$8 sm:$0x3] }
 0x10d   : > { %v2598_v29 = vpop.permute.xlu0 %1479 }
 0x10e   : > { %3411 = vst [vmem:[#allocation32_spill] sm:$0xff] %v2598_v29 }
 0x10f   : > { %v2596_v28 = vpop.permute.xlu1 %842 }
 0x110   : > { %3410 = vst [vmem:[#allocation31_spill] sm:$0xff] %v2596_v28 }
 0x112   : > { %v2611_v32 = vpop.permute.xlu0 %1135 }
 0x114   : > { %v2609_v31 = vpop.permute.xlu1 %1449 }
 0x115   : > { %v537_v36 = vpop.f32.mrf.mxu0  ;;  %v632_v37 = vpop.f32.mrf.mxu1  ;;  %3413 = vst [vmem:[#allocation33_spill] sm:$0xff] %v2609_v31 }
 0x116   : > { %v538_v38 = vadd.f32 %v537_v36, %v458_v35  ;;  %v633_v39 = vadd.f32 %v632_v37, %v561_v34 }
 0x117   : > { %v539_v40 = vpop.f32.mrf.mxu0  ;;  %v634_v41 = vpop.f32.mrf.mxu1 }
 0x118   : > { %v1807_v42 = vmul.f32 -1.442695, %v538_v38  ;;  %v1812_v43 = vmul.f32 -1.442695, %v633_v39  ;;  %v540_v44 = vadd.f32 %v539_v40, %v458_v35  ;;  %v635_v45 = vadd.f32 %v634_v41, %v561_v34  ;;  %v2617_v34 = vpop.permute.xlu0 %872 }
 0x119   : > { %v2615_v33 = vpop.permute.xlu1 %902  ;;  %3416 = vst [vmem:[#allocation35_spill] sm:$0xff] %v2617_v34 }
 0x11a   : > { %1986 = vpow2.f32 %v1807_v42  ;;  %v1808_v46 = vmul.f32 -1.442695, %v540_v44  ;;  %v1813_v47 = vmul.f32 -1.442695, %v635_v45  ;;  %3415 = vst [vmem:[#allocation34_spill] sm:$0xff] %v2615_v33 }
 0x11b   : > { %1988 = vpow2.f32 %v1812_v43 }
 0x11c   : > { %1990 = vpow2.f32 %v1808_v46  ;;  %v2625_v36 = vpop.permute.xlu0 %1539 }
 0x11d   : > { %1992 = vpow2.f32 %v1813_v47  ;;  %3419 = vst [vmem:[#allocation37_spill] sm:$0xff] %v2625_v36  ;;  %v1028_v36 = vld [vmem:[#allocation8 + $0x3] ss:$8 sm:$0x3] }
 0x11e   : > { %v2623_v35 = vpop.permute.xlu1 %1509 }
 0x11f   : > { %3418 = vst [vmem:[#allocation36_spill] sm:$0xff] %v2623_v35 }
 0x127   : > { %v1987_v48 = vpop.eup %1986 }
 0x128   : > { %v1989_v49 = vpop.eup %1988  ;;  %v548_v50 = vadd.f32 1.0, %v1987_v48 }
 0x129   : > { %v1991_v51 = vpop.eup %1990  ;;  %v643_v52 = vadd.f32 1.0, %v1989_v49 }
 0x12a   : > { %v1993_v53 = vpop.eup %1992  ;;  %1994 = vrcp.f32 %v548_v50  ;;  %v549_v54 = vadd.f32 1.0, %v1991_v51 }
 0x12b   : > { %1996 = vrcp.f32 %v643_v52  ;;  %v644_v55 = vadd.f32 1.0, %v1993_v53  ;;  %v666_v53 = vlaneseq }
 0x12c   : > { %1998 = vrcp.f32 %v549_v54 }
 0x12d   : > { %2000 = vrcp.f32 %v644_v55 }
 0x137   : > { %v1995_v56 = vpop.eup %1994 }
 0x138   : > { %v1997_v57 = vpop.eup %1996  ;;  %v2448_v58 = vmul.f32 %v1995_v56, %v538_v38  ;;  %v675_v56 = vshrl.u32 %v666_v53, 7 }
 0x139   : > { %v1999_v59 = vpop.eup %1998  ;;  %v2450_v60 = vmul.f32 %v1997_v57, %v633_v39  ;;  %v2679_v57 = vand.u32 127, %v666_v53 }
 0x13a   : > { %3389 = vst [vmem:[#allocation14_spill] sm:$0xff] %v2448_v58  ;;  %v2001_v61 = vpop.eup %2000  ;;  %651 = vst [vmem:[#allocation2] sm:$0x3] %v2448_v58  ;;  %v2453_v62 = vmul.f32 %v1999_v59, %v540_v44 }
 0x13b   : > { %v2455_v63 = vmul.f32 %v2001_v61, %v635_v45  ;;  %990 = vrot.lane.b32.xlu1 %v2450_v60, %s3305_s28  ;;  %934 = vrot.lane.b32.xlu0 %v2450_v60, %s3308_s29  ;;  %v655_v0 = vrot.slane %v2450_v60, 6  ;;  %s3309_s28 = smov 15   ;;  %s3319_s29 = smov 111   ;;  %vm966_vm2 = vcmp.lt.s32.totalorder %v2679_v57, 33  ;;  %vm1024_vm3 = vcmp.lt.s32.totalorder %v2679_v57, 31 }
 0x13c   : > { %3390 = vst [vmem:[#allocation15_spill] sm:$0xff] %v2453_v62  ;;  %652 = vst [vmem:[#allocation2 + $0x8] sm:$0x3] %v2453_v62  ;;  %vm1054_vm4 = vcmp.lt.s32.totalorder %v2679_v57, 30  ;;  %vm697_vm5 = vcmp.lt.s32.totalorder %v2679_v57, 16  ;;  %vm725_vm6 = vcmp.lt.s32.totalorder %v2679_v57, 15 }
 0x13d   : > { %v656_v1 = vrot.slane %v2455_v63, 6  ;;  %659 = vst [vmem:[#allocation2] sm:$0xc] %v655_v0  ;;  %v2685_v0 = vsub.s32 0, %v675_v56  ;;  %vm938_vm7 = vcmp.lt.s32.totalorder %v2679_v57, 34  ;;  %vm994_vm8 = vcmp.lt.s32.totalorder %v2679_v57, 32 }
 0x13e   : > { %vm1084_vm9 = vcmp.lt.s32.totalorder %v2679_v57, 18  ;;  %vm755_vm10 = vcmp.lt.s32.totalorder %v2679_v57, 1  ;;  %vm668_vm11 = vcmp.lt.s32.totalorder %v2679_v57, 17  ;;  %vm1162_vm12 = vcmp.lt.s32.totalorder %v2679_v57, 14 }
 0x13f   : > { %962 = vrot.lane.b32.xlu1 %v2450_v60, %s2207_s17  ;;  %1110 = vrot.lane.b32.xlu0 %v2450_v60, %s2208_s16  ;;  %660 = vst [vmem:[#allocation2 + $0x8] sm:$0xc] %v656_v1  ;;  %v2687_v1 = vsub.s32 1, %v675_v56  ;;  %v1033_v56 = vrot.slane %v1028_v36, %v2685_v0  ;;  %v946_v15 = vrot.slane %v941_v14, %v2685_v0  ;;  %vm853_vm13 = vcmp.lt.s32.totalorder %v2679_v57, 112 }
 0x140   : > { %vm1192_vm14 = vcmp.lt.s32.totalorder %v2679_v57, 2  ;;  %vm883_vm15 = vcmp.lt.s32.totalorder %v2679_v57, 111  ;;  %vm1370_vm0 = vcmp.lt.s32.totalorder %v2679_v57, 110  ;;  %vm793_vm1 = vcmp.lt.s32.totalorder %v2679_v57, 127 }
 0x141   : > { %v1037_v28 = vrot.slane %v1028_v36, %v2687_v1 }
 0x143   : > { %1020 = vrot.lane.b32.xlu1 %v2450_v60, %s2209_s30  ;;  %1188 = vrot.lane.b32.xlu0 %v2450_v60, %s3304_s18  ;;  %s3311_s18 = smov 16  }
 0x147   : > { %1050 = vrot.lane.b32.xlu1 %v2450_v60, %s2211_s26  ;;  %1258 = vrot.lane.b32.xlu0 %v2450_v60, %s3306_s15  ;;  %s3317_s15 = smov 1  }
 0x14b   : > { %1080 = vrot.lane.b32.xlu1 %v2450_v60, %s3307_s19  ;;  %1318 = vrot.lane.b32.xlu0 %v2450_v60, %s3313_s20  ;;  %s3318_s19 = smov 14  }
 0x14f   : > { %1126 = vrot.lane.b32.xlu1 %v2450_v60, %s3311_s18  ;;  %721 = vrot.lane.b32.xlu0 %v2448_v58, %s3309_s28  ;;  %s3315_s18 = smov 95  }
 0x153   : > { %1142 = vrot.lane.b32.xlu1 %v2450_v60, %s3309_s28  ;;  %751 = vrot.lane.b32.xlu0 %v2448_v58, %s3317_s15  ;;  %s2220_s28 = smov 127  }
 0x157   : > { %1158 = vrot.lane.b32.xlu1 %v2450_v60, %s3318_s19  ;;  %819 = vrot.lane.b32.xlu0 %v2448_v58, %s3313_s20  ;;  %s3316_s20 = smov 114   ;;  %s2227_s19 = smov 96  }
 0x15b   : > { %1218 = vrot.lane.b32.xlu1 %v2450_v60, %s3317_s15  ;;  %879 = vrot.lane.b32.xlu0 %v2448_v58, %s3319_s29 }
 0x15f   : > { %1242 = vrot.lane.b32.xlu1 %v2450_v60, %s2220_s28  ;;  %1486 = vrot.lane.b32.xlu0 %v2450_v60, %s3315_s18  ;;  %s3320_s18 = smov 112  }
 0x163   : > { %1288 = vrot.lane.b32.xlu1 %v2450_v60, %s3316_s20  ;;  %964 = vrot.lane.b32.xlu0 %v2455_v63, %s2207_s17  ;;  %s3395_s17 = smov 16   ;;  %s2225_s20 = smov 98  }
 0x167   : > { %1022 = vrot.lane.b32.xlu0 %v2455_v63, %s2209_s30  ;;  %662 = vrot.lane.b32.xlu1 %v2448_v58, %s2208_s16  ;;  %s3398_s30 = smov 15  }
 0x16b   : > { %1052 = vrot.lane.b32.xlu0 %v2455_v63, %s2211_s26  ;;  %1334 = vrot.lane.b32.xlu1 %v2450_v60, %s3320_s18  ;;  %s2224_s26 = smov 110  }
 0x16f   : > { %1128 = vrot.lane.b32.xlu0 %v2455_v63, %s3395_s17  ;;  %1350 = vrot.lane.b32.xlu1 %v2450_v60, %s3319_s29 }
 0x173   : > { %1144 = vrot.lane.b32.xlu0 %v2455_v63, %s3398_s30  ;;  %693 = vrot.lane.b32.xlu1 %v2448_v58, %s3395_s17 }
 0x177   : > { %1220 = vrot.lane.b32.xlu0 %v2455_v63, %s3317_s15  ;;  %1366 = vrot.lane.b32.xlu1 %v2450_v60, %s2224_s26  ;;  %s2226_s15 = smov 97  }
 0x17b   : > { %664 = vrot.lane.b32.xlu0 %v2453_v62, %s2208_s16  ;;  %1396 = vrot.lane.b32.xlu1 %v2450_v60, %s2225_s20 }
 0x17f   : > { %1336 = vrot.lane.b32.xlu0 %v2455_v63, %s3320_s18  ;;  %789 = vrot.lane.b32.xlu1 %v2448_v58, %s2220_s28 }
 0x183   : > { %1352 = vrot.lane.b32.xlu0 %v2455_v63, %s3319_s29  ;;  %1426 = vrot.lane.b32.xlu1 %v2450_v60, %s2226_s15  ;;  %s3406_s29 = smov 34  }
 0x187   : > { %1368 = vrot.lane.b32.xlu0 %v2455_v63, %s2224_s26  ;;  %1456 = vrot.lane.b32.xlu1 %v2450_v60, %s2227_s19  ;;  %s3409_s26 = smov 32  }
 0x18b   : > { %1398 = vrot.lane.b32.xlu0 %v2455_v63, %s2225_s20  ;;  %849 = vrot.lane.b32.xlu1 %v2448_v58, %s3320_s18  ;;  %s2228_s20 = smov 94   ;;  %s3421_s18 = smov 114  }
 0x18f   : > { %1428 = vrot.lane.b32.xlu0 %v2455_v63, %s2226_s15  ;;  %936 = vrot.lane.b32.xlu1 %v2455_v63, %s3406_s29  ;;  %s3412_s15 = smov 18   ;;  %s3425_s29 = smov 1  }
 0x193   : > { %1458 = vrot.lane.b32.xlu0 %v2455_v63, %s2227_s19  ;;  %992 = vrot.lane.b32.xlu1 %v2455_v63, %s3409_s26  ;;  %s3414_s19 = smov 14   ;;  %s3417_s26 = smov 2  }
 0x197   : > { %1516 = vrot.lane.b32.xlu0 %v2450_v60, %s2228_s20  ;;  %1082 = vrot.lane.b32.xlu1 %v2455_v63, %s3412_s15  ;;  %s3422_s15 = smov 113  }
 0x19b   : > { %1112 = vrot.lane.b32.xlu1 %v2455_v63, %s2208_s16  ;;  %914 = vperm.xlu0 %1983, %v911_v30   ;;  %s3420_s16 = smov 126   ;;  %v970_v30 = vld [vmem:[#allocation8 + $0x1] ss:$8 sm:$0x3] }
 0x19c   : > { %v975_v53 = vrot.slane %v970_v30, %v2685_v0  ;;  %v979_v33 = vrot.slane %v970_v30, %v2687_v1 }
 0x19f   : > { %1160 = vrot.lane.b32.xlu1 %v2455_v63, %s3414_s19 }
 0x1a3   : > { %1190 = vrot.lane.b32.xlu1 %v2455_v63, %s3417_s26 }
 0x1a7   : > { %1244 = vrot.lane.b32.xlu1 %v2455_v63, %s2220_s28 }
 0x1ab   : > { %1260 = vrot.lane.b32.xlu1 %v2455_v63, %s3420_s16 }
 0x1ad   : > { %v2629_v37 = vpop.permute.xlu1 %990  ;;  %v2631_v38 = vpop.permute.xlu0 %934 }
 0x1af   : > { %1290 = vrot.lane.b32.xlu1 %v2455_v63, %s3421_s18 }
 0x1b1   : > { %v963_v39 = vpop.permute.xlu1 %962  ;;  %v2635_v40 = vpop.permute.xlu0 %1110 }
 0x1b3   : > { %1320 = vrot.lane.b32.xlu1 %v2455_v63, %s3422_s15 }
 0x1b5   : > { %v1021_v41 = vpop.permute.xlu1 %1020  ;;  %v2639_v42 = vpop.permute.xlu0 %1188 }
 0x1b7   : > { %723 = vrot.lane.b32.xlu1 %v2453_v62, %s3398_s30  ;;  %s3434_s30 = smov 95  }
 0x1b9   : > { %v2643_v43 = vpop.permute.xlu1 %1050  ;;  %v2645_v44 = vpop.permute.xlu0 %1258 }
 0x1ba   : > { %3423 = vst [vmem:[#allocation38_spill] sm:$0xff] %v2645_v44  ;;  %v950_v44 = vrot.slane %v941_v14, %v2687_v1  ;;  %v1093_v14 = vrot.slane %v1088_v26, %v2685_v0 }
 0x1bb   : > { %695 = vrot.lane.b32.xlu1 %v2453_v62, %s3395_s17  ;;  %s3429_s17 = smov 112  }
 0x1bd   : > { %v2649_v45 = vpop.permute.xlu1 %1080  ;;  %v2651_v46 = vpop.permute.xlu0 %1318 }
 0x1be   : > { %3424 = vst [vmem:[#allocation39_spill] sm:$0xff] %v2651_v46 }
 0x1bf   : > { %753 = vrot.lane.b32.xlu1 %v2453_v62, %s3425_s29  ;;  %s444_s29 = sand.u32 1, %s2164_s22  }
 0x1c0   : > { %s1687_s18 = scalar_lea.sflag [#allocation5], %s444_s29 }
 0x1c1   : > { %v2655_v47 = vpop.permute.xlu1 %1126  ;;  %v2657_v48 = vpop.permute.xlu0 %721 }
 0x1c2   : > { %3426 = vst [vmem:[#allocation40_spill] sm:$0xff] %v2657_v48 }
 0x1c3   : > { %791 = vrot.lane.b32.xlu1 %v2453_v62, %s2220_s28  ;;  %s3431_s28 = smov 111  }
 0x1c5   : > { %v2661_v49 = vpop.permute.xlu1 %1142  ;;  %v2663_v50 = vpop.permute.xlu0 %751 }
 0x1c6   : > { %3427 = vst [vmem:[#allocation41_spill] sm:$0xff] %v2663_v50 }
 0x1c7   : > { %821 = vrot.lane.b32.xlu1 %v2453_v62, %s3422_s15 }
 0x1c9   : > { %v2667_v51 = vpop.permute.xlu1 %1158  ;;  %v2669_v52 = vpop.permute.xlu0 %819 }
 0x1ca   : > { %3428 = vst [vmem:[#allocation42_spill] sm:$0xff] %v2669_v52 }
 0x1cb   : > { %851 = vrot.lane.b32.xlu1 %v2453_v62, %s3429_s17  ;;  %s1801_s17 = sshll.u32 %s444_s29, 4 }
 0x1cd   : > { %v2673_v54 = vpop.permute.xlu1 %1218  ;;  %v2675_v55 = vpop.permute.xlu0 %879 }
 0x1ce   : > { %3430 = vst [vmem:[#allocation43_spill] sm:$0xff] %v2675_v55 }
 0x1cf   : > { %881 = vrot.lane.b32.xlu1 %v2453_v62, %s3431_s28  ;;  %v1589_v62 = vld [vmem:[%s3298_s10] sm:$0xff]  ;;  %s1827_s28 = sshll.u32 %s2316_s25, 8  ;;  %s2108_s25 = sshll.u32 %s2229_s0, 4  ;;  %s2109_s25 = int_to_ptr.vmem [resolvable:$false] %s2108_s25 }
 0x1d0   : > { %s1699_s16 = scalar_lea.hbm %s3300_s12, %s1827_s28 }
 0x1d1   : > { %v2681_v59 = vpop.permute.xlu1 %1242  ;;  %v2683_v61 = vpop.permute.xlu0 %1486 }
 0x1d2   : > { %3432 = vst [vmem:[#allocation44_spill] sm:$0xff] %v2681_v59  ;;  %3433 = vst [vmem:[#allocation45_spill] sm:$0xff] %v2683_v61 }
 0x1d3   : > { %1488 = vrot.lane.b32.xlu1 %v2455_v63, %s3434_s30  ;;  %s446_s30 = scalar_lea.vmem [#allocation9], %s1801_s17  ;;  %s2110_s17 = scalar_lea.vmem %s2109_s25, 512 }
 0x1d4   : > { %s1701_s19 = sshll.u32 %s446_s30, 4  ;;  %s1702_s19 = int_to_ptr.vmem [resolvable:$true] %s1701_s19 }
 0x1d5   : > { %v2692_v35 = vpop.permute.xlu1 %1288  ;;  %v965_v55 = vpop.permute.xlu0 %964  ;;  %s2104_s15 = scalar_lea.vmem %s1702_s19, 256  ;;  %p2111_p4 = scmp.lt.s32.totalorder %s1702_s19, %s2109_s25 }
 0x1d6   : > { %3435 = vst [vmem:[#allocation46_spill] sm:$0xff] %v2692_v35  ;;  %v967_v34 = vsel %vm966_vm2, %v963_v39, %v965_v55  ;;  %v968_v61 = vsel %vm966_vm2, %v965_v55, %v963_v39  ;;  %v2802_v35 = vrot.slane %v887_v16, %v2687_v1  ;;  %vm1262_vm2 = vcmp.lt.s32.totalorder %v2679_v57, 126  ;;  %p2105_p12 = scmp.ne.s32.totalorder %s1702_s19, %s2104_s15  ;;  %p2112_p5 = scmp.lt.s32.totalorder %s2110_s17, %s2104_s15 }
 0x1d7   : > { %1518 = vrot.lane.b32.xlu1 %v2455_v63, %s2228_s20  ;;  %v982_v23 = vmul.f32 %v975_v53, %v968_v61  ;;  %v983_v22 = vmul.f32 %v979_v33, %v967_v34  ;;  %v759_v53 = vld [vmem:[#allocation8 + $0x13] ss:$8 sm:$0x3] }
 0x1d8   : > { %v2776_v31 = vrot.slane %v759_v53, %v2687_v1  ;;  %3450 = vst [vmem:[#allocation61_spill] sm:$0xff] %v2802_v35  ;;  %p2106_p9 = pnand %p2105_p12, %p3519_p2  ;;  %p2113_p6 = por %p2112_p5, %p2111_p4 }
 0x1d9   : > { %v1023_v52 = vpop.permute.xlu0 %1022  ;;  %v2704_v30 = vpop.permute.xlu1 %662  ;;  %v988_v36 = vmul.f32 %v2484_v4, %v982_v23  ;;  %v989_v25 = vmul.f32 %v2484_v4, %v983_v22 }
 0x1da   : > { %v1025_v50 = vsel %vm1024_vm3, %v1021_v41, %v1023_v52  ;;  %v1026_v39 = vsel %vm1024_vm3, %v1023_v52, %v1021_v41  ;;  %v729_v52 = vld [vmem:[#allocation8 + $0x10] ss:$8 sm:$0x3]  ;;  %vm1400_vm3 = vcmp.lt.s32.totalorder %v2679_v57, 98  ;;  %p2107_p3 = pneg %p2106_p9 }
 0x1db   : > { %v1040_v55 = vmul.f32 %v1033_v56, %v1026_v39  ;;  %v1041_v29 = vmul.f32 %v1037_v28, %v1025_v50  ;;  %1551 = vperm.xlu1 %1984, %v1548_v27   ;;  %v672_v56 = vld [vmem:[#allocation8 + $0x6] ss:$8 sm:$0x3] }
 0x1dc   : > { %v2779_v17 = vrot.slane %v672_v56, %v2685_v0  ;;  %v2786_v46 = vrot.slane %v672_v56, %v2687_v1  ;;  %v2817_v56 = vld [vmem:[#allocation8 + $0x11] ss:$8 sm:$0x3]  ;;  %p2114_p10 = pnand %p2113_p6, %p2107_p3 }
 0x1dd   : > { %v1046_v58 = vmul.f32 %v2562_v20, %v1040_v55  ;;  %v1047_v33 = vmul.f32 %v2562_v20, %v1041_v29  ;;  %v2713_v34 = vpop.permute.xlu1 %1334  ;;  %v2723_v50 = vpop.permute.xlu0 %1052  ;;  %v2744_v55 = vmul.f32 %v2526_v13, %v2450_v60 }
 0x1de   : > { %v1056_v12 = vsel %vm1054_vm4, %v2723_v50, %v2643_v43 }
 0x1df   : > { %v2715_v61 = vadd.f32 %v1046_v58, %v988_v36  ;;  %v2717_v41 = vadd.f32 %v1047_v33, %v989_v25  ;;  %1592 = vperm.xlu1 %1984, %v1589_v62   ;;  %v2737_v25 = vld [vmem:[#allocation8 + $0x4] ss:$8 sm:$0x3]  ;;  %v701_v62 = vld [vmem:[#allocation8 + $0x7] ss:$8 sm:$0x3]  ;;  %v2748_v36 = vmul.f32 %v2526_v13, %v2455_v63  ;;  %v2765_v63 = vrot.slane %v729_v52, %v2685_v0 }
 0x1e0   : > { %3441 = vst [vmem:[#allocation52_spill] sm:$0xff] %v2744_v55  ;;  %v2758_v48 = vrot.slane %v701_v62, %v2685_v0  ;;  %v2761_v60 = vrot.slane %v701_v62, %v2687_v1  ;;  %v2767_v13 = vld [vmem:[#allocation8 + $0x23] ss:$8 sm:$0x3]  ;;  %v2773_v33 = vrot.slane %v759_v53, %v2685_v0  ;;  %v2795_v55 = vrot.slane %v887_v16, %v2685_v0 }
 0x1e1   : > { %v2719_v27 = vpop.permute.xlu1 %1350  ;;  %v2729_v22 = vpop.permute.xlu0 %1128  ;;  %3442 = vst [vmem:[#allocation53_spill] sm:$0xff] %v2748_v36  ;;  %3443 = vst [vmem:[#allocation54_spill] sm:$0xff] %v2767_v13  ;;  %v2781_v62 = vld [vmem:[#allocation8 + $0x24] ss:$8 sm:$0x3]  ;;  %v2789_v36 = vrot.slane %v857_v24, %v2685_v0  ;;  %v2859_v13 = vrot.slane %v797_v8, %v2685_v0 }
 0x1e2   : > { %3444 = vst [vmem:[#allocation55_spill] sm:$0xff] %v2781_v62  ;;  %3447 = vst [vmem:[#allocation58_spill] sm:$0xff] %v2795_v55  ;;  %v2827_v62 = vld [vmem:[#allocation8 + $0x12] ss:$8 sm:$0x3]  ;;  %v3455_v55 = vrot.slane %v2737_v25, %v2687_v1 }
 0x1e3   : > { %3451 = vst [vmem:[#allocation62_spill] sm:$0xff] %v2827_v62  ;;  %3452 = vst [vmem:[#allocation63_spill] sm:$0xff] %v2859_v13 }
 0x1e5   : > { %v2721_v28 = vpop.permute.xlu1 %693  ;;  %v2733_v29 = vpop.permute.xlu0 %1144 }
 0x1e6   : > { %3436 = vst [vmem:[#allocation47_spill] sm:$0xff] %v2721_v28 }
 0x1e9   : > { %v2725_v23 = vpop.permute.xlu1 %1366  ;;  %v2755_v28 = vpop.permute.xlu0 %1220 }
 0x1ed   : > { %v2727_v4 = vpop.permute.xlu1 %1396  ;;  %v2819_v21 = vpop.permute.xlu0 %664 }
 0x1ee   : > { %3437 = vst [vmem:[#allocation48_spill] sm:$0xff] %v2727_v4 }
 0x1f1   : > { %v2731_v20 = vpop.permute.xlu1 %789 }
 0x1f2   : > { %3438 = vst [vmem:[#allocation49_spill] sm:$0xff] %v2731_v20  ;;  %v2770_v20 = vrot.slane %v729_v52, %v2687_v1  ;;  %v2792_v52 = vrot.slane %v857_v24, %v2687_v1  ;;  %v998_v24 = vld [vmem:[#allocation8 + $0x2] ss:$8 sm:$0x3] }
 0x1f3   : > { %v1003_v16 = vrot.slane %v998_v24, %v2685_v0 }
 0x1f4   : > { %3446 = vst [vmem:[#allocation57_spill] sm:$0xff] %v2792_v52 }
 0x1f5   : > { %v2735_v58 = vpop.permute.xlu1 %1426 }
 0x1f6   : > { %3439 = vst [vmem:[#allocation50_spill] sm:$0xff] %v2735_v58  ;;  %v1097_v58 = vrot.slane %v1088_v26, %v2687_v1  ;;  %v1131_v26 = vsel %vm697_vm5, %v2729_v22, %v2655_v47 }
 0x1f9   : > { %v2740_v39 = vpop.permute.xlu1 %1456 }
 0x1fa   : > { %3440 = vst [vmem:[#allocation51_spill] sm:$0xff] %v2740_v39  ;;  %v2783_v39 = vld [vmem:[#allocation8 + $0x25] ss:$8 sm:$0x3] }
 0x1fb   : > { %3445 = vst [vmem:[#allocation56_spill] sm:$0xff] %v2783_v39  ;;  %v1007_v39 = vrot.slane %v998_v24, %v2687_v1 }
 0x1fd   : > { %v2797_v53 = vpop.permute.xlu1 %849 }
 0x1fe   : > { %3448 = vst [vmem:[#allocation59_spill] sm:$0xff] %v2797_v53  ;;  %v1055_v53 = vsel %vm1054_vm4, %v2643_v43, %v2723_v50  ;;  %v1146_v43 = vsel %vm725_vm6, %v2661_v49, %v2733_v29  ;;  %vm1430_vm4 = vcmp.lt.s32.totalorder %v2679_v57, 97 }
 0x1ff   : > { %v1071_v59 = vmul.f32 %v3455_v55, %v1055_v53 }
 0x201   : > { %v937_v4 = vpop.permute.xlu1 %936 }
 0x202   : > { %v939_v18 = vsel %vm938_vm7, %v2631_v38, %v937_v4  ;;  %v940_v24 = vsel %vm938_vm7, %v937_v4, %v2631_v38  ;;  %v2862_v38 = vrot.slane %v797_v8, %v2687_v1  ;;  %v1130_v4 = vsel %vm697_vm5, %v2655_v47, %v2729_v22 }
 0x203   : > { %v1147_v8 = vsel %vm725_vm6, %v2733_v29, %v2661_v49  ;;  %v953_v13 = vmul.f32 %v946_v15, %v940_v24  ;;  %v954_v35 = vmul.f32 %v950_v44, %v939_v18  ;;  %v3454_v49 = vrot.slane %v2737_v25, %v2685_v0 }
 0x204   : > { %3453 = vst [vmem:[#allocation64_spill] sm:$0xff] %v2862_v38  ;;  %v2883_v38 = vpop.permute.xlu0 %1336  ;;  %v1132_v15 = vmul.f32 %v1131_v26, %v2758_v48  ;;  %v1133_v18 = vmul.f32 %v1130_v4, %v2761_v60  ;;  %v1271_v44 = vrot.slane %v2881_v19, %v2685_v0  ;;  %v1149_v24 = vmul.f32 %v1146_v43, %v2770_v20 }
 0x205   : > { %v993_v50 = vpop.permute.xlu1 %992  ;;  %v1070_v29 = vmul.f32 %v3454_v49, %v1056_v12  ;;  %v1148_v12 = vmul.f32 %v1147_v8, %v2765_v63  ;;  %v960_v53 = vmul.f32 %v2468_v2, %v953_v13  ;;  %v1077_v43 = vmul.f32 %v2486_v5, %v1071_v59 }
 0x206   : > { %v995_v47 = vsel %vm994_vm8, %v2629_v37, %v993_v50  ;;  %v996_v22 = vsel %vm994_vm8, %v993_v50, %v2629_v37  ;;  %v1275_v37 = vrot.slane %v2881_v19, %v2687_v1  ;;  %v1138_v13 = vmul.f32 %v2611_v32, %v1132_v15 }
 0x207   : > { %v1010_v62 = vmul.f32 %v1003_v16, %v996_v22  ;;  %v1011_v52 = vmul.f32 %v1007_v39, %v995_v47  ;;  %v961_v16 = vmul.f32 %v2468_v2, %v954_v35  ;;  %v1076_v8 = vmul.f32 %v2486_v5, %v1070_v29 }
 0x208   : > { %v1139_v2 = vmul.f32 %v2611_v32, %v1133_v18  ;;  %v1353_v35 = vpop.permute.xlu0 %1352  ;;  %v1223_v5 = vsel %vm755_vm10, %v2755_v28, %v2673_v54  ;;  %v1155_v47 = vmul.f32 %v2506_v9, %v1149_v24  ;;  %vm1292_vm7 = vcmp.lt.s32.totalorder %v2679_v57, 114 }
 0x209   : > { %v1016_v25 = vmul.f32 %v2478_v3, %v1010_v62  ;;  %v1017_v39 = vmul.f32 %v2478_v3, %v1011_v52  ;;  %v1083_v55 = vpop.permute.xlu1 %1082  ;;  %vm823_vm8 = vcmp.lt.s32.totalorder %v2679_v57, 113 }
 0x20a   : > { %v1085_v26 = vsel %vm1084_vm9, %v2649_v45, %v1083_v55  ;;  %v1086_v4 = vsel %vm1084_vm9, %v1083_v55, %v2649_v45  ;;  %v1222_v45 = vsel %vm755_vm10, %v2673_v54, %v2755_v28  ;;  %v669_v55 = vsel %vm668_vm11, %v2704_v30, %v2819_v21 }
 0x20b   : > { %v1100_v3 = vmul.f32 %v1093_v14, %v1086_v4  ;;  %v1101_v62 = vmul.f32 %v1097_v58, %v1085_v26  ;;  %v1018_v52 = vadd.f32 %v1016_v25, %v960_v53  ;;  %v1019_v50 = vadd.f32 %v1017_v39, %v961_v16 }
 0x20c   : > { %v1154_v14 = vmul.f32 %v2506_v9, %v1148_v12  ;;  %v1224_v9 = vmul.f32 %v1223_v5, %v2773_v33  ;;  %v1225_v15 = vmul.f32 %v1222_v45, %v2776_v31  ;;  %v670_v53 = vsel %vm668_vm11, %v2819_v21, %v2704_v30  ;;  %v1369_v16 = vpop.permute.xlu0 %1368 }
 0x20d   : > { %v1106_v32 = vmul.f32 %v2498_v7, %v1100_v3  ;;  %v1107_v59 = vmul.f32 %v2498_v7, %v1101_v62  ;;  %v1113_v58 = vpop.permute.xlu1 %1112  ;;  %v1078_v18 = vadd.f32 %v1076_v8, %v1018_v52  ;;  %v1079_v12 = vadd.f32 %v1077_v43, %v1019_v50 }
 0x20e   : > { %v1114_v22 = vsel %vm668_vm11, %v2635_v40, %v1113_v58  ;;  %v1115_v54 = vsel %vm668_vm11, %v1113_v58, %v2635_v40  ;;  %v3456_v43 = vrot.slane %v2817_v56, %v2685_v0  ;;  %v3457_v62 = vrot.slane %v2817_v56, %v2687_v1 }
 0x20f   : > { %v1108_v28 = vadd.f32 %v1106_v32, %v2715_v61  ;;  %v1109_v49 = vadd.f32 %v1107_v59, %v2717_v41  ;;  %v1116_v29 = vmul.f32 %v1115_v54, %v2779_v17  ;;  %v1117_v7 = vmul.f32 %v1114_v22, %v2786_v46  ;;  %v2951_v41 = vld [vmem:[#allocation8 + $0x17] ss:$8 sm:$0x3] }
 0x210   : > { %v1230_v21 = vmul.f32 %v2516_v10, %v1224_v9  ;;  %v1231_v30 = vmul.f32 %v2516_v10, %v1225_v15  ;;  %v684_v32 = vmul.f32 %v2779_v17, %v670_v53  ;;  %v685_v59 = vmul.f32 %v2786_v46, %v669_v55  ;;  %v1399_v54 = vpop.permute.xlu0 %1398  ;;  %v827_v15 = vld [vmem:[#allocation8 + $0x20] ss:$8 sm:$0x3]  ;;  %v3464_v55 = vld [vmem:[#allocation61_spill] sm:$0xff] }
 0x211   : > { %v1122_v24 = vmul.f32 %v2496_v6, %v1116_v29  ;;  %v1123_v40 = vmul.f32 %v2496_v6, %v1117_v7  ;;  %v1140_v25 = vadd.f32 %v1138_v13, %v1108_v28  ;;  %v1141_v61 = vadd.f32 %v1139_v2, %v1109_v49  ;;  %v1161_v39 = vpop.permute.xlu1 %1160  ;;  %v3458_v28 = vld [vmem:[#allocation57_spill] sm:$0xff] }
 0x212   : > { %v1163_v6 = vsel %vm1162_vm12, %v2667_v51, %v1161_v39  ;;  %v1164_v26 = vsel %vm1162_vm12, %v1161_v39, %v2667_v51  ;;  %v1301_v2 = vrot.slane %v2951_v41, %v2685_v0  ;;  %v1305_v51 = vrot.slane %v2951_v41, %v2687_v1 }
 0x213   : > { %v1124_v4 = vadd.f32 %v1122_v24, %v1078_v18  ;;  %v1125_v8 = vadd.f32 %v1123_v40, %v1079_v12  ;;  %v1178_v3 = vmul.f32 %v3456_v43, %v1164_v26  ;;  %v1179_v13 = vmul.f32 %v3457_v62, %v1163_v6  ;;  %v3459_v18 = vld [vmem:[#allocation62_spill] sm:$0xff]  ;;  %v3462_v40 = vld [vmem:[#allocation44_spill] sm:$0xff]  ;;  %v3468_v43 = vld [vmem:[#allocation23_spill] sm:$0xff] }
 0x214   : > { %v1338_v10 = vsel %vm853_vm13, %v2713_v34, %v2883_v38  ;;  %v1339_v58 = vsel %vm853_vm13, %v2883_v38, %v2713_v34  ;;  %v1355_v34 = vsel %vm883_vm15, %v1353_v35, %v2719_v27  ;;  %v1371_v38 = vsel %vm1370_vm0, %v2725_v23, %v1369_v16 }
 0x215   : > { %v1184_v52 = vmul.f32 %v2518_v11, %v1178_v3  ;;  %v1185_v50 = vmul.f32 %v2518_v11, %v1179_v13  ;;  %v1156_v56 = vadd.f32 %v1154_v14, %v1124_v4  ;;  %v1157_v45 = vadd.f32 %v1155_v47, %v1125_v8  ;;  %v1191_v5 = vpop.permute.xlu1 %1190 }
 0x216   : > { %v1193_v17 = vsel %vm1192_vm14, %v2639_v42, %v1191_v5  ;;  %v1194_v46 = vsel %vm1192_vm14, %v1191_v5, %v2639_v42  ;;  %v1354_v47 = vsel %vm883_vm15, %v2719_v27, %v1353_v35  ;;  %v1372_v22 = vsel %vm1370_vm0, %v1369_v16, %v2725_v23  ;;  %v3465_v16 = vld [vmem:[#allocation54_spill] sm:$0xff]  ;;  %v3470_v5 = vld [vmem:[#allocation63_spill] sm:$0xff] }
 0x217   : > { %v1186_v11 = vadd.f32 %v1184_v52, %v1140_v25  ;;  %v1187_v14 = vadd.f32 %v1185_v50, %v1141_v61  ;;  %v1340_v42 = vmul.f32 %v1338_v10, %v2789_v36  ;;  %v1341_v49 = vmul.f32 %v1339_v58, %v3458_v28  ;;  %v3463_v61 = vld [vmem:[#allocation58_spill] sm:$0xff]  ;;  %v3471_v58 = vld [vmem:[#allocation64_spill] sm:$0xff] }
 0x218   : > { %v3460_v27 = vrot.slane %v3459_v18, %v2685_v0  ;;  %v3461_v12 = vrot.slane %v3459_v18, %v2687_v1  ;;  %v1356_v39 = vmul.f32 %v1354_v47, %v3463_v61  ;;  %v1357_v53 = vmul.f32 %v1355_v34, %v3464_v55  ;;  %v3473_v47 = vld [vmem:[#allocation38_spill] sm:$0xff] }
 0x219   : > { %v1232_v29 = vadd.f32 %v1230_v21, %v1186_v11  ;;  %v1233_v7 = vadd.f32 %v1231_v30, %v1187_v14  ;;  %v1245_v9 = vpop.permute.xlu1 %1244  ;;  %v3466_v6 = vrot.slane %v3465_v16, %v2685_v0  ;;  %v3467_v4 = vrot.slane %v3465_v16, %v2687_v1  ;;  %v3469_v30 = vld [vmem:[#allocation22_spill] sm:$0xff]  ;;  %v1429_v14 = vpop.permute.xlu0 %1428 }
 0x21a   : > { %v1208_v35 = vmul.f32 %v3460_v27, %v1194_v46  ;;  %v1209_v24 = vmul.f32 %v3461_v12, %v1193_v17  ;;  %v1246_v23 = vsel %vm793_vm1, %v3462_v40, %v1245_v9  ;;  %v1247_v25 = vsel %vm793_vm1, %v1245_v9, %v3462_v40  ;;  %v3475_v9 = vld [vmem:[#allocation29_spill] sm:$0xff]  ;;  %v3476_v27 = vld [vmem:[#allocation48_spill] sm:$0xff] }
 0x21b   : > { %v1386_v26 = vmul.f32 %v3466_v6, %v1371_v38  ;;  %v1387_v8 = vmul.f32 %v3467_v4, %v1372_v22  ;;  %v3037_v3 = vmul.f32 %v3468_v43, %v684_v32  ;;  %v3040_v62 = vmul.f32 %v3468_v43, %v685_v59  ;;  %v3472_v59 = vld [vmem:[#allocation16_spill] sm:$0xff] }
 0x21c   : > { %v3043_v13 = vrot.slane %v827_v15, %v2685_v0  ;;  %v3046_v21 = vrot.slane %v827_v15, %v2687_v1  ;;  %v1346_v52 = vmul.f32 %v3469_v30, %v1340_v42  ;;  %v1347_v50 = vmul.f32 %v3469_v30, %v1341_v49  ;;  %v3474_v22 = vld [vmem:[#allocation24_spill] sm:$0xff] }
 0x21d   : > { %vm1460_vm9 = vcmp.lt.s32.totalorder %v2679_v57, 96  ;;  %v1248_v10 = vmul.f32 %v1246_v23, %v3470_v5  ;;  %v1249_v32 = vmul.f32 %v1247_v25, %v3471_v58  ;;  %v1261_v11 = vpop.permute.xlu1 %1260  ;;  %v1214_v17 = vmul.f32 %v3472_v59, %v1208_v35  ;;  %v3477_v23 = vld [vmem:[#allocation50_spill] sm:$0xff] }
 0x21e   : > { %v1215_v46 = vmul.f32 %v3472_v59, %v1209_v24  ;;  %v1263_v34 = vsel %vm1262_vm2, %v3473_v47, %v1261_v11  ;;  %v1264_v38 = vsel %vm1262_vm2, %v1261_v11, %v3473_v47  ;;  %v1362_v42 = vmul.f32 %v3474_v22, %v1356_v39  ;;  %v3486_v47 = vld [vmem:[#allocation17_spill] sm:$0xff] }
 0x21f   : > { %v1363_v49 = vmul.f32 %v3474_v22, %v1357_v53  ;;  %v1392_v15 = vmul.f32 %v3475_v9, %v1386_v26  ;;  %v1393_v18 = vmul.f32 %v3475_v9, %v1387_v8  ;;  %v1401_v35 = vsel %vm1400_vm3, %v3476_v27, %v1399_v54  ;;  %v3478_v53 = vld [vmem:[#allocation19_spill] sm:$0xff]  ;;  %v1459_v22 = vpop.permute.xlu0 %1458 }
 0x220   : > { %v1402_v12 = vsel %vm1400_vm3, %v1399_v54, %v3476_v27  ;;  %v1278_v24 = vmul.f32 %v1271_v44, %v1263_v34  ;;  %v1279_v40 = vmul.f32 %v1275_v37, %v1264_v38  ;;  %v1431_v25 = vsel %vm1430_vm4, %v3477_v23, %v1429_v14  ;;  %v3479_v44 = vld [vmem:[#allocation46_spill] sm:$0xff]  ;;  %v3480_v8 = vld [vmem:[#allocation55_spill] sm:$0xff] }
 0x221   : > { %v1432_v39 = vsel %vm1430_vm4, %v1429_v14, %v3477_v23  ;;  %v1254_v16 = vmul.f32 %v3478_v53, %v1248_v10  ;;  %v1255_v54 = vmul.f32 %v3478_v53, %v1249_v32  ;;  %v1291_v6 = vpop.permute.xlu1 %1290  ;;  %v1216_v26 = vadd.f32 %v1214_v17, %v1156_v56  ;;  %v3483_v32 = vld [vmem:[#allocation56_spill] sm:$0xff]  ;;  %v3489_v53 = vld [vmem:[#allocation53_spill] sm:$0xff] }
 0x222   : > { %v1217_v4 = vadd.f32 %v1215_v46, %v1157_v45  ;;  %v1293_v19 = vsel %vm1292_vm7, %v3479_v44, %v1291_v6  ;;  %v1294_v37 = vsel %vm1292_vm7, %v1291_v6, %v3479_v44  ;;  %v3481_v43 = vrot.slane %v3480_v8, %v2685_v0  ;;  %v3490_v6 = vld [vmem:[#allocation39_spill] sm:$0xff] }
 0x223   : > { %v3482_v10 = vrot.slane %v3480_v8, %v2687_v1  ;;  %v1308_v56 = vmul.f32 %v1301_v2, %v1293_v19  ;;  %v1309_v45 = vmul.f32 %v1305_v51, %v1294_v37  ;;  %v3484_v14 = vrot.slane %v3483_v32, %v2685_v0  ;;  %v3487_v2 = vld [vmem:[#allocation18_spill] sm:$0xff] }
 0x224   : > { %v1416_v30 = vmul.f32 %v3481_v43, %v1401_v35  ;;  %v3485_v17 = vrot.slane %v3483_v32, %v2687_v1  ;;  %v1284_v34 = vmul.f32 %v3486_v47, %v1278_v24  ;;  %v1285_v38 = vmul.f32 %v3486_v47, %v1279_v40  ;;  %v3492_v43 = vld [vmem:[#allocation21_spill] sm:$0xff]  ;;  %v3494_v47 = vld [vmem:[#allocation40_spill] sm:$0xff] }
 0x225   : > { %v1417_v11 = vmul.f32 %v3482_v10, %v1402_v12  ;;  %v1446_v59 = vmul.f32 %v3484_v14, %v1431_v25  ;;  %v1256_v9 = vadd.f32 %v1254_v16, %v1232_v29  ;;  %v1257_v27 = vadd.f32 %v1255_v54, %v1233_v7  ;;  %v1321_v51 = vpop.permute.xlu1 %1320  ;;  %v3488_v12 = vld [vmem:[#allocation52_spill] sm:$0xff]  ;;  %v3491_v54 = vld [vmem:[#allocation51_spill] sm:$0xff]  ;;  %v3493_v32 = vld [vmem:[#allocation33_spill] sm:$0xff] }
 0x226   : > { %v1447_v46 = vmul.f32 %v3485_v17, %v1432_v39  ;;  %v1314_v35 = vmul.f32 %v3487_v2, %v1308_v56  ;;  %v1315_v41 = vmul.f32 %v3487_v2, %v1309_v45  ;;  %v1240_v23 = vadd.f32 %v3488_v12, %v1216_v26 }
 0x227   : > { %v1241_v25 = vadd.f32 %v3489_v53, %v1217_v4  ;;  %v1322_v39 = vsel %vm823_vm8, %v3490_v6, %v1321_v51  ;;  %v1323_v24 = vsel %vm823_vm8, %v1321_v51, %v3490_v6  ;;  %v1461_v26 = vsel %vm1460_vm9, %v3491_v54, %v1459_v22  ;;  %v3498_v53 = vld [vmem:[#allocation20_spill] sm:$0xff] }
 0x228   : > { %v1316_v40 = vadd.f32 %v1314_v35, %v1256_v9  ;;  %v1317_v29 = vadd.f32 %v1315_v41, %v1257_v27  ;;  %v1324_v7 = vmul.f32 %v1322_v39, %v3043_v13  ;;  %v1325_v16 = vmul.f32 %v1323_v24, %v3046_v21  ;;  %v3495_v27 = vld [vmem:[#allocation60_spill] sm:$0xff] }
 0x229   : > { %v1462_v4 = vsel %vm1460_vm9, %v1459_v22, %v3491_v54  ;;  %v1286_v44 = vadd.f32 %v1284_v34, %v1240_v23  ;;  %v1287_v19 = vadd.f32 %v1285_v38, %v1241_v25  ;;  %v724_v45 = vpop.permute.xlu1 %723  ;;  %v1452_v14 = vmul.f32 %v3493_v32, %v1446_v59 }
 0x22a   : > { %v1348_v37 = vadd.f32 %v1346_v52, %v1316_v40  ;;  %v1349_v8 = vadd.f32 %v1347_v50, %v1317_v29  ;;  %v1330_v10 = vmul.f32 %v3492_v43, %v1324_v7  ;;  %v1331_v56 = vmul.f32 %v3492_v43, %v1325_v16  ;;  %v3500_v7 = vld [vmem:[#allocation14_spill] sm:$0xff]  ;;  %v3501_v16 = vld [vmem:[#allocation28_spill] sm:$0xff] }
 0x22b   : > { %v1453_v17 = vmul.f32 %v3493_v32, %v1447_v46  ;;  %v726_v9 = vsel %vm725_vm6, %v3494_v47, %v724_v45  ;;  %v727_v34 = vsel %vm725_vm6, %v724_v45, %v3494_v47  ;;  %v3496_v2 = vrot.slane %v3495_v27, %v2685_v0  ;;  %v3504_v45 = vld [vmem:[#allocation41_spill] sm:$0xff]  ;;  %v3505_v32 = vld [vmem:[#allocation47_spill] sm:$0xff] }
 0x22c   : > { %v1332_v38 = vadd.f32 %v1330_v10, %v1286_v44  ;;  %v1333_v52 = vadd.f32 %v1331_v56, %v1287_v19  ;;  %v741_v50 = vmul.f32 %v2765_v63, %v727_v34  ;;  %v742_v22 = vmul.f32 %v2770_v20, %v726_v9  ;;  %v3499_v63 = vld [vmem:[#allocation27_spill] sm:$0xff]  ;;  %v3506_v34 = vld [vmem:[#allocation49_spill] sm:$0xff] }
 0x22d   : > { %v1476_v59 = vmul.f32 %v3496_v2, %v1461_v26  ;;  %v3497_v46 = vrot.slane %v3495_v27, %v2687_v1  ;;  %v1394_v41 = vadd.f32 %v1392_v15, %v1348_v37  ;;  %v1395_v51 = vadd.f32 %v1393_v18, %v1349_v8  ;;  %v696_v39 = vpop.permute.xlu1 %695  ;;  %v3502_v15 = vld [vmem:[#allocation15_spill] sm:$0xff]  ;;  %v3503_v26 = vld [vmem:[#allocation32_spill] sm:$0xff] }
 0x22e   : > { %v1364_v12 = vadd.f32 %v1362_v42, %v1332_v38  ;;  %v1365_v23 = vadd.f32 %v1363_v49, %v1333_v52  ;;  %v747_v25 = vmul.f32 %v3498_v53, %v741_v50  ;;  %v748_v6 = vmul.f32 %v3498_v53, %v742_v22  ;;  %v3507_v22 = vld [vmem:[#allocation42_spill] sm:$0xff] }
 0x22f   : > { %v1477_v35 = vmul.f32 %v3497_v46, %v1462_v4  ;;  %v1422_v24 = vmul.f32 %v3499_v63, %v1416_v30  ;;  %v1423_v20 = vmul.f32 %v3499_v63, %v1417_v11  ;;  %v3151_v40 = vadd.f32 %v1452_v14, %v1394_v41 }
 0x230   : > { %v3153_v29 = vadd.f32 %v1453_v17, %v1395_v51  ;;  %v785_v54 = vmul.f32 %v3501_v16, %v3500_v7  ;;  %v786_v42 = vmul.f32 %v3501_v16, %v3502_v15  ;;  %v749_v49 = vadd.f32 %v747_v25, %v3037_v3  ;;  %v1494_v25 = vld [vmem:[#allocation8 + $0x27] ss:$8 sm:$0x3] }
 0x231   : > { %v750_v18 = vadd.f32 %v748_v6, %v3040_v62  ;;  %v1482_v4 = vmul.f32 %v3503_v26, %v1476_v59  ;;  %v1483_v30 = vmul.f32 %v3503_v26, %v1477_v35  ;;  %v1424_v44 = vadd.f32 %v1422_v24, %v1364_v12  ;;  %v754_v19 = vpop.permute.xlu1 %753  ;;  %v3508_v35 = vld [vmem:[#allocation25_spill] sm:$0xff]  ;;  %v3509_v6 = vld [vmem:[#allocation59_spill] sm:$0xff]  ;;  %v3511_v24 = vld [vmem:[#allocation30_spill] sm:$0xff] }
 0x232   : > { %v1425_v11 = vadd.f32 %v1423_v20, %v1365_v23  ;;  %v787_v37 = vadd.f32 %v785_v54, %v749_v49  ;;  %v756_v3 = vsel %vm755_vm10, %v3504_v45, %v754_v19  ;;  %v757_v62 = vsel %vm755_vm10, %v754_v19, %v3504_v45  ;;  %v3512_v15 = vld [vmem:[#allocation31_spill] sm:$0xff]  ;;  %v1524_v26 = vld [vmem:[#allocation8 + $0x30] ss:$8 sm:$0x3] }
 0x233   : > { %v788_v8 = vadd.f32 %v786_v42, %v750_v18  ;;  %v3163_v43 = vadd.f32 %v1482_v4, %v1424_v44  ;;  %v698_v14 = vsel %vm697_vm5, %v3505_v32, %v696_v39  ;;  %v699_v17 = vsel %vm697_vm5, %v696_v39, %v3505_v32  ;;  %v3513_v4 = vld [vmem:[#allocation35_spill] sm:$0xff] }
 0x234   : > { %v3165_v10 = vadd.f32 %v1483_v30, %v1425_v11  ;;  %v771_v47 = vmul.f32 %v2773_v33, %v757_v62  ;;  %v772_v9 = vmul.f32 %v2776_v31, %v756_v3  ;;  %v713_v33 = vmul.f32 %v2758_v48, %v699_v17  ;;  %v3514_v30 = vld [vmem:[#allocation43_spill] sm:$0xff]  ;;  %v1517_v3 = vpop.permute.xlu0 %1516 }
 0x235   : > { %v792_v56 = vpop.permute.xlu1 %791  ;;  %v714_v31 = vmul.f32 %v2761_v60, %v698_v14  ;;  %vm1490_vm5 = vcmp.lt.s32.totalorder %v2679_v57, 95  ;;  %v1499_v7 = vrot.slane %v1494_v25, %v2685_v0  ;;  %v1503_v45 = vrot.slane %v1494_v25, %v2687_v1 }
 0x236   : > { %v794_v38 = vsel %vm793_vm1, %v3506_v34, %v792_v56  ;;  %v795_v52 = vsel %vm793_vm1, %v792_v56, %v3506_v34  ;;  %v777_v41 = vmul.f32 %v3508_v35, %v771_v47  ;;  %v778_v51 = vmul.f32 %v3508_v35, %v772_v9  ;;  %v3515_v47 = vld [vmem:[#allocation34_spill] sm:$0xff] }
 0x237   : > { %v809_v59 = vmul.f32 %v3470_v5, %v794_v38  ;;  %v810_v46 = vmul.f32 %v3471_v58, %v795_v52  ;;  %v3510_v5 = vld [vmem:[#allocation26_spill] sm:$0xff]  ;;  %vm1520_vm6 = vcmp.lt.s32.totalorder %v2679_v57, 94  ;;  %v1529_v62 = vrot.slane %v1524_v26, %v2685_v0 }
 0x238   : > { %v719_v58 = vmul.f32 %v3510_v5, %v713_v33  ;;  %v720_v39 = vmul.f32 %v3510_v5, %v714_v31  ;;  %v1533_v32 = vrot.slane %v1524_v26, %v2687_v1  ;;  %v3518_v5 = vld [vmem:[#allocation37_spill] sm:$0xff]  ;;  %vm1595_vm10 = vcmask 64512  }
 0x239   : > { %v822_v50 = vpop.permute.xlu1 %821  ;;  %v816_v20 = vmul.f32 %v3511_v24, %v810_v46  ;;  %v3517_v46 = vld [vmem:[#allocation36_spill] sm:$0xff] }
 0x23a   : > { %v824_v27 = vsel %vm823_vm8, %v3507_v22, %v822_v50  ;;  %v825_v2 = vsel %vm823_vm8, %v822_v50, %v3507_v22  ;;  %v779_v16 = vadd.f32 %v777_v41, %v719_v58  ;;  %v780_v54 = vadd.f32 %v778_v51, %v720_v39  ;;  %v3516_v50 = vld [vmem:[#allocation45_spill] sm:$0xff] }
 0x23b   : > { %v839_v12 = vmul.f32 %v3043_v13, %v824_v27  ;;  %v840_v23 = vmul.f32 %v3046_v21, %v825_v2  ;;  %v815_v21 = vmul.f32 %v3511_v24, %v809_v59  ;;  %v915_v59 = vpop.permute.xlu0 %914 }
 0x23c   : > { %v818_v17 = vadd.f32 %v816_v20, %v780_v54 }
 0x23d   : > { %v852_v53 = vpop.permute.xlu1 %851  ;;  %v845_v42 = vmul.f32 %v3512_v15, %v839_v12  ;;  %v846_v49 = vmul.f32 %v3512_v15, %v840_v23  ;;  %v817_v14 = vadd.f32 %v815_v21, %v779_v16 }
 0x23e   : > { %v854_v48 = vsel %vm853_vm13, %v3509_v6, %v852_v53  ;;  %v855_v60 = vsel %vm853_vm13, %v852_v53, %v3509_v6 }
 0x23f   : > { %v869_v63 = vmul.f32 %v2789_v36, %v854_v48  ;;  %v870_v13 = vmul.f32 %v3458_v28, %v855_v60  ;;  %v847_v52 = vadd.f32 %v845_v42, %v787_v37 }
 0x241   : > { %v882_v18 = vpop.permute.xlu1 %881  ;;  %v875_v36 = vmul.f32 %v3513_v4, %v869_v63  ;;  %v876_v28 = vmul.f32 %v3513_v4, %v870_v13 }
 0x242   : > { %v884_v44 = vsel %vm883_vm15, %v3514_v30, %v882_v18  ;;  %v885_v11 = vsel %vm883_vm15, %v882_v18, %v3514_v30 }
 0x243   : > { %v899_v19 = vmul.f32 %v3463_v61, %v884_v44  ;;  %v900_v56 = vmul.f32 %v3464_v55, %v885_v11  ;;  %v848_v61 = vadd.f32 %v846_v49, %v788_v8  ;;  %v877_v0 = vadd.f32 %v875_v36, %v817_v14 }
 0x244   : > { %v878_v27 = vadd.f32 %v876_v28, %v818_v17 }
 0x245   : > { %v905_v9 = vmul.f32 %v3515_v47, %v899_v19  ;;  %v906_v34 = vmul.f32 %v3515_v47, %v900_v56  ;;  %v1489_v38 = vpop.permute.xlu1 %1488 }
 0x246   : > { %v1491_v55 = vsel %vm1490_vm5, %v3516_v50, %v1489_v38  ;;  %v1492_v22 = vsel %vm1490_vm5, %v1489_v38, %v3516_v50 }
 0x247   : > { %v1506_v1 = vmul.f32 %v1499_v7, %v1491_v55  ;;  %v1507_v2 = vmul.f32 %v1503_v45, %v1492_v22  ;;  %v907_v33 = vadd.f32 %v905_v9, %v847_v52  ;;  %v908_v31 = vadd.f32 %v906_v34, %v848_v61  ;;  %v1586_v34 = vld [vmem:[%s3297_s9] sm:$0xff] }
 0x249   : > { %v1513_v35 = vmul.f32 %v3517_v46, %v1507_v2  ;;  %v1519_v41 = vpop.permute.xlu1 %1518  ;;  %v909_v37 = vadd.f32 %v907_v33, %v877_v0  ;;  %v910_v8 = vadd.f32 %v908_v31, %v878_v27  ;;  %v1512_v51 = vmul.f32 %v3517_v46, %v1506_v1 }
 0x24a   : > { %v1521_v12 = vsel %vm1520_vm6, %v1517_v3, %v1519_v41  ;;  %v1522_v23 = vsel %vm1520_vm6, %v1519_v41, %v1517_v3 }
 0x24b   : > { %v1536_v53 = vmul.f32 %v1529_v62, %v1521_v12  ;;  %v1537_v25 = vmul.f32 %v1533_v32, %v1522_v23  ;;  %v917_v6 = vadd.f32 %v915_v59, %v909_v37  ;;  %v918_v48 = vadd.f32 %v915_v59, %v910_v8 }
 0x24c   : > { %v1515_v60 = vadd.f32 %v1513_v35, %v3153_v29  ;;  %v1514_v24 = vadd.f32 %v1512_v51, %v3151_v40 }
 0x24d   : > { %v1542_v58 = vmul.f32 %v3518_v5, %v1536_v53  ;;  %v1543_v39 = vmul.f32 %v3518_v5, %v1537_v25  ;;  %v1814_v63 = vmul.f32 -1.442695, %v917_v6  ;;  %v1815_v13 = vmul.f32 -1.442695, %v918_v48 }
 0x24f   : > { %2002 = vpow2.f32 %v1814_v63  ;;  %v1544_v21 = vadd.f32 %v1542_v58, %v3163_v43  ;;  %v1545_v57 = vadd.f32 %v1543_v39, %v3165_v10 }
 0x250   : > { %2004 = vpow2.f32 %v1815_v13 }
 0x251   : > { %v1546_v20 = vadd.f32 %v1544_v21, %v1514_v24  ;;  %v1547_v7 = vadd.f32 %v1545_v57, %v1515_v60 }
 0x256   : > { %v1552_v16 = vpop.permute.xlu1 %1551 }
 0x257   : > { %v1554_v54 = vadd.f32 %v1552_v16, %v1546_v20  ;;  %v1555_v15 = vadd.f32 %v1552_v16, %v1547_v7 }
 0x259   : > { %v1816_v29 = vmul.f32 -1.442695, %v1554_v54  ;;  %v1817_v42 = vmul.f32 -1.442695, %v1555_v15 }
 0x25a   : > { %v1593_v38 = vpop.permute.xlu1 %1592 }
 0x25b   : > { %2006 = vpow2.f32 %v1816_v29 }
 0x25c   : > { %v2003_v49 = vpop.eup %2002  ;;  %2008 = vpow2.f32 %v1817_v42 }
 0x25d   : > { %v2005_v18 = vpop.eup %2004  ;;  %v925_v26 = vadd.f32 1.0, %v2003_v49 }
 0x25e   : > { %v926_v4 = vadd.f32 1.0, %v2005_v18 }
 0x25f   : > { %2010 = vrcp.f32 %v925_v26 }
 0x260   : > { %2012 = vrcp.f32 %v926_v4 }
 0x268   : > { %v2007_v40 = vpop.eup %2006 }
 0x269   : > { %v2009_v43 = vpop.eup %2008  ;;  %v1562_v36 = vadd.f32 1.0, %v2007_v40 }
 0x26a   : > { %v1563_v10 = vadd.f32 1.0, %v2009_v43 }
 0x26b   : > { %2014 = vrcp.f32 %v1562_v36 }
 0x26c   : > { %v2011_v28 = vpop.eup %2010  ;;  %2016 = vrcp.f32 %v1563_v10 }
 0x26d   : > { %v2013_v30 = vpop.eup %2012  ;;  %v931_v44 = vmul.f32 %v2011_v28, %v917_v6 }
 0x26e   : > { %v932_v11 = vmul.f32 %v2013_v30, %v918_v48 }
 0x26f   : > { %v1572_v19 = vrot.slane %v931_v44, 4 }
 0x270   : > { %v1573_v56 = vrot.slane %v932_v11, 4 }
 0x271   : > { %1576 = vst [vmem:[#allocation2] sm:$0x30] %v1572_v19 }
 0x272   : > { %1577 = vst [vmem:[#allocation2 + $0x8] sm:$0x30] %v1573_v56 }
 0x278   : > { %v2015_v45 = vpop.eup %2014 }
 0x279   : > { %v2017_v3 = vpop.eup %2016  ;;  %v1568_v62 = vmul.f32 %v2015_v45, %v1554_v54 }
 0x27a   : > { %v1569_v32 = vmul.f32 %v2017_v3, %v1555_v15 }
 0x27b   : > { %v1580_v14 = vrot.slane %v1568_v62, 2 }
 0x27c   : > { %v1581_v17 = vrot.slane %v1569_v32, 2 }
 0x27d   : > { %1584 = vst [vmem:[#allocation2] sm:$0xc0] %v1580_v14 }
 0x27e   : > { %1585 = vst [vmem:[#allocation2 + $0x8] sm:$0xc0] %v1581_v17 }
 0x284   : > { %v1587_v47 = vld [vmem:[#allocation2] sm:$0xff] }
 0x285   : > { %v1588_v9 = vld [vmem:[#allocation2 + $0x8] sm:$0xff] }
 0x286   : > { %1629 = vmatprep.subr.mxu0 %v1588_v9 }
 0x287   : > { %1630 = vmatpush1.msra.mxu0 %v1587_v47 }
 0x288   : > { %1818 = vmatmul.mubr.msk.f32.vlgmr.msra.gmra.mxu0 %vm1595_vm10, %v1586_v34 }
 0x348   : > { %v1665_v52 = vpop.f32.mrf.mxu0 }
 0x349   : > { %v1666_v61 = vadd.f32 %v1665_v52, %v1593_v38 }
 0x34a   : > { %v1667_v50 = vpop.f32.mrf.mxu0 }
 0x34b   : > { %v1819_v55 = vmul.f32 -1.442695, %v1666_v61  ;;  %v1668_v22 = vadd.f32 %v1667_v50, %v1593_v38 }
 0x34d   : > { %2018 = vpow2.f32 %v1819_v55  ;;  %v1820_v0 = vmul.f32 -1.442695, %v1668_v22 }
 0x34f   : > { %2020 = vpow2.f32 %v1820_v0 }
 0x35a   : > { %v2019_v27 = vpop.eup %2018 }
 0x35b   : > { %v1676_v1 = vadd.f32 1.0, %v2019_v27 }
 0x35c   : > { %v2021_v2 = vpop.eup %2020 }
 0x35d   : > { %2022 = vrcp.f32 %v1676_v1  ;;  %v1677_v33 = vadd.f32 1.0, %v2021_v2 }
 0x35f   : > { %2024 = vrcp.f32 %v1677_v33 }
 0x36a   : > { %v2023_v31 = vpop.eup %2022 }
 0x36b   : > { %v1682_v59 = vmul.f32 %v2023_v31, %v1666_v61 }
 0x36c   : > { %v2025_v46 = vpop.eup %2024 }
 0x36d   : > { %1684 = vst [vmem:[%s446_s30] sm:$0xff] %v1682_v59  ;;  %v1683_v35 = vmul.f32 %v2025_v46, %v1668_v22 }
 0x36f   : > { %1685 = vst [vmem:[%s446_s30 + $0x8] sm:$0xff] %v1683_v35 }
 0x370   : > { %2117 = shalt.err (!%p2114_p10)
}
 0x371   : > { %s2118_s1 = scalar_lea.hbm %s1699_s16, 256  ;;  %s2122_s30 = scalar_lea.hbm %s3300_s12, 512 }
 0x372   : > { %p2119_p7 = scmp.ne.s32.totalorder %s1699_s16, %s2118_s1  ;;  %p2123_p11 = scmp.lt.s32.totalorder %s1699_s16, %s3300_s12 }
 0x373   : > { %p2124_p0 = scmp.lt.s32.totalorder %s2122_s30, %s2118_s1 }
 0x374   : > { %p2120_p13 = pnand %p2119_p7, %p3519_p2 }
 0x375   : > { %p2125_p1 = por %p2124_p0, %p2123_p11 }
 0x376   : > { %p2121_p8 = pneg %p2120_p13 }
 0x378   : > { %p2126_p12 = pnand %p2125_p1, %p2121_p8 }
 0x37a   : > { %2129 = shalt.err (!%p2126_p12)
}
 0x37b   : > { %1840 = dma.vmem_to_hbm [thread:$0]  (%p3519_p2), %s1702_s19, 256, %s1699_s16, %s1687_s18  }
 0x37c PF: > { %p1862_p9 = scmp.ge.s32.totalorder %s2172_s24, 2  ;;  %s1713_s0 = sand.u32 1, %s2160_s21  }
 0x37d   : > { %p3520_p3 = scmp.ne.s32.totalorder %s3379_s14, 0  ;;  %s1714_s15 = scalar_lea.sflag [#allocation5], %s1713_s0 }
 0x37f   : > { %p1853_p4 = pnand %p1862_p9, %p3520_p3 }
 0x381   : > { %p1854_p5 = pneg %p1853_p4 }
 0x383   : > { %2155 = dma.done.wait (%p1854_p5), %s1714_s15, 256  }
 0x384   : > { %2157 = vsyncadd (%p1854_p5), %s1714_s15, 4294967040  ;;  %s3521_s1 = sld [smem:[#allocation13_spill]]  ;;  %p24_p6 = scmp.ge.s32.totalorder %s2320_s27, 4  }
 0x385   : > { %s3522_s21 = smov %s2164_s22  ;;  %s3523_s22 = smov %s2168_s23 }
 0x386   : > { %s3525_s24 = smov %s2320_s27  ;;  %26 = sbr.rel (!%p24_p6) target bundleno = 8 (0x8), region = 139 }
 0x38a   : > { %s3524_s23 = smov %s3521_s1 }
 0x38b   :  { %1719 = vsyncpa [#allocation4], 1 }
 0x38c   :  { %1721 = vsyncpa [#allocation4 + $0x1], 1 }
 0x38d   :  { %1722 = vsyncpa [#allocation7], 1 }
 0x38e   :  { %1723 = vsyncpa [#allocation5], 1 }
 0x38f   :  { %1725 = vsyncpa [#allocation5 + $0x1], 1 }

</bundles_post_ra>
